<compile_context>
chip_gen: v7x
topology: tpu7x:2x2x1
jax: 0.10.0
libtpu: 0.0.40
codegen_flags: <defaults>
</compile_context>

<pallas_src>
import functools

import jax
import jax.numpy as jnp
from jax.experimental import pallas as pl
from jax.experimental.pallas import tpu as pltpu


# ----------------------------------------------------------------------------
# Per-generation scoped-VMEM limit.
# ----------------------------------------------------------------------------
@functools.lru_cache(maxsize=None)
def _vmem_limit_bytes():
    try:
        cap = int(pltpu.get_tpu_info().vmem_capacity_bytes)
    except Exception:
        return 64 * 1024 * 1024
    if cap >= 96 * 1024 * 1024:        # v5e / v6e: 128 MiB physical VMEM
        return 100 * 1024 * 1024
    return 48 * 1024 * 1024            # v7x: 64 MiB physical VMEM


# ----------------------------------------------------------------------------
# Tiled linear kernels (y = x @ w [+ b]).
# ----------------------------------------------------------------------------
def _matmul_kernel(x_ref, w_ref, o_ref, acc_ref):
    @pl.when(pl.program_id(2) == 0)
    def _():
        acc_ref[...] = jnp.zeros_like(acc_ref)

    acc_ref[...] += jnp.dot(
        x_ref[...], w_ref[...], preferred_element_type=jnp.float32
    )

    @pl.when(pl.program_id(2) == pl.num_programs(2) - 1)
    def _():
        o_ref[...] = acc_ref[...].astype(o_ref.dtype)


def _matmul_bias_kernel(x_ref, w_ref, b_ref, o_ref, acc_ref):
    @pl.when(pl.program_id(2) == 0)
    def _():
        acc_ref[...] = jnp.zeros_like(acc_ref)

    acc_ref[...] += jnp.dot(
        x_ref[...], w_ref[...], preferred_element_type=jnp.float32
    )

    @pl.when(pl.program_id(2) == pl.num_programs(2) - 1)
    def _():
        o_ref[...] = (acc_ref[...] + b_ref[...].astype(jnp.float32)).astype(
            o_ref.dtype
        )


# Single-K-tile variants: whole contraction in one MXU pass, no scratch,
# no pl.when phases (the K grid axis is collapsed).
def _matmul_1k_kernel(x_ref, w_ref, o_ref):
    o_ref[...] = jnp.dot(
        x_ref[...], w_ref[...], preferred_element_type=jnp.float32
    ).astype(o_ref.dtype)


def _matmul_bias_1k_kernel(x_ref, w_ref, b_ref, o_ref):
    acc = jnp.dot(x_ref[...], w_ref[...], preferred_element_type=jnp.float32)
    o_ref[...] = (acc + b_ref[...].astype(jnp.float32)).astype(o_ref.dtype)


def _pick_tile(dim, target, align):
    """Largest divisor of `dim` that is <= target and a multiple of `align`.

    Falls back to the full dim, which is always a legal block shape."""
    if dim <= target:
        return dim
    best = None
    t = align
    while t <= target:
        if dim % t == 0:
            best = t
        t += align
    return best if best is not None else dim


def _linear(x, w, bias=None, out_dtype=jnp.float32, tm=512, tn=512, tk_max=1024):
    M, K = x.shape
    Kw, O = w.shape
    assert K == Kw
    tm = _pick_tile(M, tm, 16)                         # sublane-aligned
    tn = _pick_tile(O, tn, 128)                        # lane-aligned
    tk = K if K <= tk_max else _pick_tile(K, tk_max, 128)

    x_b = jnp.dtype(x.dtype).itemsize
    w_b = jnp.dtype(w.dtype).itemsize
    o_b = jnp.dtype(out_dtype).itemsize
    cost = pl.CostEstimate(
        flops=2 * M * K * O + (M * O if bias is not None else 0),
        transcendentals=0,
        bytes_accessed=(M * K * x_b + K * O * w_b + M * O * o_b
                        + (O * 4 if bias is not None else 0)),
    )

    if tk == K:
        # K collapsed -> 2-D grid, direct write, no accumulator scratch.
        grid = (M // tm, O // tn)
        x_spec = pl.BlockSpec((tm, tk), lambda i, j: (i, 0))
        w_spec = pl.BlockSpec((tk, tn), lambda i, j: (0, j))
        o_spec = pl.BlockSpec((tm, tn), lambda i, j: (i, j))
        b_spec = pl.BlockSpec((1, tn), lambda i, j: (0, j))
        dims = ("parallel", "parallel")
        scratch = []
        if bias is None:
            kernel, operands, in_specs = _matmul_1k_kernel, (x, w), [x_spec, w_spec]
        else:
            kernel, operands, in_specs = (
                _matmul_bias_1k_kernel, (x, w, bias), [x_spec, w_spec, b_spec])
    else:
        grid = (M // tm, O // tn, K // tk)
        x_spec = pl.BlockSpec((tm, tk), lambda i, j, k: (i, k))
        w_spec = pl.BlockSpec((tk, tn), lambda i, j, k: (k, j))
        o_spec = pl.BlockSpec((tm, tn), lambda i, j, k: (i, j))
        b_spec = pl.BlockSpec((1, tn), lambda i, j, k: (0, j))
        dims = ("parallel", "parallel", "arbitrary")
        scratch = [pltpu.VMEM((tm, tn), jnp.float32)]
        if bias is None:
            kernel, operands, in_specs = _matmul_kernel, (x, w), [x_spec, w_spec]
        else:
            kernel, operands, in_specs = (
                _matmul_bias_kernel, (x, w, bias), [x_spec, w_spec, b_spec])

    return pl.pallas_call(
        kernel,
        grid=grid,
        in_specs=in_specs,
        out_specs=o_spec,
        out_shape=jax.ShapeDtypeStruct((M, O), out_dtype),
        scratch_shapes=scratch,
        cost_estimate=cost,
        compiler_params=pltpu.CompilerParams(
            dimension_semantics=dims,
            vmem_limit_bytes=_vmem_limit_bytes(),
        ),
    )(*operands)


# ----------------------------------------------------------------------------
# Attention kernel: grid = (batch, q-tile).  The (1, N, 3C) qkv block is
# indexed only by batch (resident across q-tiles); output is a lane-dense
# (1, tq, C) block.  Heads are processed in lane-aligned groups and each
# group's context is stored directly, bounding live score/exp buffers.
# ----------------------------------------------------------------------------
def _attn_kernel(qkv_ref, o_ref, *, num_heads):
    N = qkv_ref.shape[1]
    C = o_ref.shape[2]
    tq = o_ref.shape[1]
    Dh = C // num_heads

    row0 = pl.multiple_of(pl.program_id(1) * tq, tq)

    # Scale is already folded into the q columns of w_qkv / b_qkv (wrapper).
    q_rows = qkv_ref[0, pl.ds(row0, tq), :]            # (tq, 3C)
    q = q_rows[:, 0:C]                                 # (tq, C)
    k = qkv_ref[0, :, C:2 * C]                         # (N, C)
    v = qkv_ref[0, :, 2 * C:3 * C]                     # (N, C)

    # Head-group size: group*Dh lanes per store (128-aligned when possible).
    if Dh <= 128 and 128 % Dh == 0:
        group = min(num_heads, 128 // Dh)
        while num_heads % group:
            group -= 1
    else:
        group = 1

    # TODO(synk): for very long N (>~1.5-2K, esp. v7x 64 MiB VMEM) switch to a
    # flash-style online-softmax loop streaming K/V tiles from HBM.
    for g0 in range(0, num_heads, group):
        outs = []
        for h in range(g0, g0 + group):
            lo = h * Dh
            qh = q[:, lo:lo + Dh]
            kh = k[:, lo:lo + Dh]
            vh = v[:, lo:lo + Dh]
            # q @ k^T via dot_general contracting last dims (no k^T copy).
            s = jax.lax.dot_general(
                qh, kh, (((1,), (1,)), ((), ())),
                preferred_element_type=jnp.float32,
            )                                          # (tq, N) f32
            m = jnp.max(s, axis=-1, keepdims=True)
            e = jnp.exp(s - m)
            p = e * pl.reciprocal(jnp.sum(e, axis=-1, keepdims=True), approx=True)
            outs.append(
                jnp.dot(p.astype(vh.dtype), vh, preferred_element_type=jnp.float32)
            )
        blk = outs[0] if group == 1 else jnp.concatenate(outs, axis=-1)
        o_ref[0, :, g0 * Dh:(g0 + group) * Dh] = blk.astype(o_ref.dtype)


def _pick_tq(n, target=512):
    t = _pick_tile(n, target, 16)
    if t == n and n > target:
        t = _pick_tile(n, target, 8)
    return t


def _attention_core(qkv3, num_heads, out_dtype):
    B, N, C3 = qkv3.shape
    C = C3 // 3
    tq = _pick_tq(N)

    in_b = jnp.dtype(qkv3.dtype).itemsize
    out_b = jnp.dtype(out_dtype).itemsize
    cost = pl.CostEstimate(
        flops=4 * B * N * N * C,                       # QK^T + PV over all heads
        transcendentals=B * num_heads * N * N,         # exp
        bytes_accessed=B * N * C3 * in_b + B * N * C * out_b,
    )

    return pl.pallas_call(
        functools.partial(_attn_kernel, num_heads=num_heads),
        grid=(B, N // tq),
        in_specs=[pl.BlockSpec((1, N, C3), lambda b, qi: (b, 0, 0))],
        out_specs=pl.BlockSpec((1, tq, C), lambda b, qi: (b, qi, 0)),
        out_shape=jax.ShapeDtypeStruct((B, N, C), out_dtype),
        cost_estimate=cost,
        compiler_params=pltpu.CompilerParams(
            dimension_semantics=("parallel", "parallel"),
            vmem_limit_bytes=_vmem_limit_bytes(),
        ),
    )(qkv3)


# ----------------------------------------------------------------------------
# Parameters + forward wrapper
# ----------------------------------------------------------------------------
def init_attention_params(key, dim, num_heads=8, qkv_bias=False):
    assert dim % num_heads == 0
    k1, k2, k3 = jax.random.split(key, 3)
    params = {
        # PyTorch nn.Linear convention: weight shape (out_features, in_features)
        "w_qkv": 0.02 * jax.random.normal(k1, (3 * dim, dim), jnp.float32),
        "w_proj": 0.02 * jax.random.normal(k2, (dim, dim), jnp.float32),
        "b_proj": 0.02 * jax.random.normal(k3, (dim,), jnp.float32),
    }
    if qkv_bias:
        params["b_qkv"] = jnp.zeros((3 * dim,), jnp.float32)
    return params


@functools.partial(jax.jit, static_argnames=("num_heads", "compute_dtype"))
def attention_forward(x, params, num_heads=8, compute_dtype=jnp.bfloat16):
    B, N, C = x.shape
    assert C % num_heads == 0
    Dh = C // num_heads
    scale = float(Dh) ** -0.5
    cd = jnp.dtype(compute_dtype)

    # Fold the softmax scale into the q columns of the qkv weight (and bias):
    # a one-time O(C*3C) op, done in f32 before the bf16 cast.
    col_scale = jnp.concatenate(
        [jnp.full((C,), scale, jnp.float32), jnp.ones((2 * C,), jnp.float32)]
    )
    w_qkv = (params["w_qkv"].T * col_scale[None, :]).astype(cd)     # (C, 3C)
    w_proj = params["w_proj"].T.astype(cd)                          # (C, C)
    b_proj = params["b_proj"].reshape(1, C).astype(jnp.float32)
    b_qkv = params.get("b_qkv")
    if b_qkv is not None:
        b_qkv = (b_qkv * col_scale).reshape(1, 3 * C).astype(jnp.float32)

    x2d = x.reshape(B * N, C).astype(cd)

    # --- qkv = self.qkv(x): tiled matmul -------------------------------------
    qkv = _linear(x2d, w_qkv, bias=b_qkv, out_dtype=cd)             # (B*N, 3C)

    # Free contiguous reshape (no XLA permute / HBM round trip).
    qkv3 = qkv.reshape(B, N, 3 * C)

    # --- softmax(q k^T * scale) @ v, q-tiled, all heads per step -------------
    ctx = _attention_core(qkv3, num_heads, cd)                      # (B, N, C)

    # --- x = self.proj(x): tiled matmul + bias, emitted in caller's dtype ----
    y = _linear(ctx.reshape(B * N, C), w_proj, bias=b_proj,
                out_dtype=x.dtype)                                  # (B*N, C)

    # TODO(synk): attn_drop / proj_drop have ratio 0.0 -> identity (eval mode).
    return y.reshape(B, N, C)


# ----------------------------------------------------------------------------
# Pure-JAX reference (same math, no Pallas)
# ----------------------------------------------------------------------------
def attention_reference(x, params, num_heads=8):
    B, N, C = x.shape
    Dh = C // num_heads
    scale = float(Dh) ** -0.5
    qkv = x @ params["w_qkv"].T
    if "b_qkv" in params:
        qkv = qkv + params["b_qkv"]
    qkv = qkv.reshape(B, N, 3, num_heads, Dh).transpose(2, 0, 3, 1, 4)
    q, k, v = qkv[0], qkv[1], qkv[2]
    attn = jnp.einsum("bhqd,bhkd->bhqk", q, k) * scale
    attn = jax.nn.softmax(attn, axis=-1)
    out = jnp.einsum("bhqk,bhkd->bhqd", attn, v)
    out = out.transpose(0, 2, 1, 3).reshape(B, N, C)
    return out @ params["w_proj"].T + params["b_proj"]


if __name__ == "__main__":
    B, N, C, H = 2, 8, 32, 8   # seq=8, hidden=32, heads=8 -> head_dim=4
    key = jax.random.PRNGKey(0)
    kx, kp = jax.random.split(key)
    x = jax.random.normal(kx, (B, N, C), jnp.float32)
    params = init_attention_params(kp, C, num_heads=H, qkv_bias=False)

    y_ref = attention_reference(x, params, num_heads=H)

    # f32 compute path: tight check of the math (approx reciprocal allowed for).
    y_f32 = attention_forward(x, params, num_heads=H, compute_dtype=jnp.float32)
    y_f32 = jax.block_until_ready(y_f32)
    assert y_f32.shape == (B, N, C)
    assert jnp.allclose(y_f32, y_ref, atol=2e-3, rtol=2e-3), "f32 mismatch vs reference"

    # bf16 MXU path (default performance path): looser tolerance.
    y_bf16 = attention_forward(x, params, num_heads=H, compute_dtype=jnp.bfloat16)
    y_bf16 = jax.block_until_ready(y_bf16)
    assert y_bf16.shape == (B, N, C)
    assert jnp.allclose(y_bf16.astype(jnp.float32), y_ref, atol=3e-2, rtol=3e-2), \
        "bf16 mismatch vs reference"

    print("KERNEL_OK")
</pallas_src>

<mosaic_0001>
module attributes {stable_mosaic.version = 11 : i64} {
  func.func @_matmul_1k_kernel(%arg0: i32, %arg1: i32, %arg2: memref<16x32xf32, #tpu.memory_space<vmem>>, %arg3: memref<32x96xf32, #tpu.memory_space<vmem>>, %arg4: memref<16x96xf32, #tpu.memory_space<vmem>>) attributes {dimension_semantics = [#tpu.dimension_semantics<parallel>, #tpu.dimension_semantics<parallel>], iteration_bounds = array<i64: 1, 1>, scalar_prefetch = 0 : i64, scratch_operands = 0 : i64, tpu.core_type = #tpu.core_type<tc>, window_params = [{transform_indices = @transform_0, window_bounds = array<i64: 16, 32>}, {transform_indices = @transform_1, window_bounds = array<i64: 32, 96>}, {transform_indices = @transform_2, window_bounds = array<i64: 16, 96>}]} {
    %c0 = arith.constant 0 : index
    %c0_0 = arith.constant 0 : index
    %0 = vector.load %arg2[%c0, %c0_0] : memref<16x32xf32, #tpu.memory_space<vmem>>, vector<16x32xf32>
    %c0_1 = arith.constant 0 : index
    %c0_2 = arith.constant 0 : index
    %1 = vector.load %arg3[%c0_1, %c0_2] : memref<32x96xf32, #tpu.memory_space<vmem>>, vector<32x96xf32>
    %cst = arith.constant dense<0.000000e+00> : vector<16x96xf32>
    %2 = tpu.matmul %0, %1, %cst {dimension_numbers = #tpu.dot_dimension_numbers<[1], [0], [0], [1], [0, 0, 1, 1], [], []>} : vector<16x32xf32>, vector<32x96xf32>, vector<16x96xf32> -> vector<16x96xf32>
    %c0_3 = arith.constant 0 : index
    %c0_4 = arith.constant 0 : index
    %3 = vector.load %arg4[%c0_3, %c0_4] : memref<16x96xf32, #tpu.memory_space<vmem>>, vector<16x96xf32>
    tpu.vector_store %arg4[%c0_3, %c0_4], %2 {strides = array<i32>} : memref<16x96xf32, #tpu.memory_space<vmem>>, vector<16x96xf32>,
    return
  }
  func.func @transform_0(%arg0: i32, %arg1: i32) -> (i32, i32) {
    %c0_i32 = arith.constant 0 : i32
    %c0_i32_0 = arith.constant 0 : i32
    return %arg0, %c0_i32 : i32, i32
  }
  func.func @transform_1(%arg0: i32, %arg1: i32) -> (i32, i32) {
    %c0_i32 = arith.constant 0 : i32
    %c0_i32_0 = arith.constant 0 : i32
    return %c0_i32, %arg1 : i32, i32
  }
  func.func @transform_2(%arg0: i32, %arg1: i32) -> (i32, i32) {
    %c0_i32 = arith.constant 0 : i32
    return %arg0, %arg1 : i32, i32
  }
}

module attributes {stable_mosaic.version = 11 : i64} {
  func.func @_attn_kernel(%arg0: i32, %arg1: i32, %arg2: memref<1x8x96xf32, #tpu.memory_space<vmem>>, %arg3: memref<1x8x32xf32, #tpu.memory_space<vmem>>) attributes {dimension_semantics = [#tpu.dimension_semantics<parallel>, #tpu.dimension_semantics<parallel>], iteration_bounds = array<i64: 2, 1>, scalar_prefetch = 0 : i64, scratch_operands = 0 : i64, tpu.core_type = #tpu.core_type<tc>, window_params = [{transform_indices = @transform_0, window_bounds = array<i64: 1, 8, 96>}, {transform_indices = @transform_1, window_bounds = array<i64: 1, 8, 32>}]} {
    %c8_i32 = arith.constant 8 : i32
    %0 = arith.muli %arg1, %c8_i32 : i32
    %1 = tpu.assume_multiple %0, 8 : i32
    %c0 = arith.constant 0 : index
    %2 = arith.index_cast %1 : i32 to index
    %c0_0 = arith.constant 0 : index
    %3 = vector.load %arg2[%c0, %2, %c0_0] : memref<1x8x96xf32, #tpu.memory_space<vmem>>, vector<1x8x96xf32>
    %4 = vector.shape_cast %3 : vector<1x8x96xf32> to vector<8x96xf32>
    %5 = vector.extract_strided_slice %4 {offsets = [0, 0], sizes = [8, 32], strides = [1, 1]} : vector<8x96xf32> to vector<8x32xf32>
    %c0_1 = arith.constant 0 : index
    %c0_2 = arith.constant 0 : index
    %c32 = arith.constant 32 : index
    %6 = vector.load %arg2[%c0_1, %c0_2, %c32] : memref<1x8x96xf32, #tpu.memory_space<vmem>>, vector<1x8x32xf32>
    %7 = vector.shape_cast %6 : vector<1x8x32xf32> to vector<8x32xf32>
    %c0_3 = arith.constant 0 : index
    %c0_4 = arith.constant 0 : index
    %c64 = arith.constant 64 : index
    %8 = vector.load %arg2[%c0_3, %c0_4, %c64] : memref<1x8x96xf32, #tpu.memory_space<vmem>>, vector<1x8x32xf32>
    %9 = vector.shape_cast %8 : vector<1x8x32xf32> to vector<8x32xf32>
    %10 = vector.extract_strided_slice %5 {offsets = [0, 0], sizes = [8, 4], strides = [1, 1]} : vector<8x32xf32> to vector<8x4xf32>
    %11 = vector.extract_strided_slice %7 {offsets = [0, 0], sizes = [8, 4], strides = [1, 1]} : vector<8x32xf32> to vector<8x4xf32>
    %12 = vector.extract_strided_slice %9 {offsets = [0, 0], sizes = [8, 4], strides = [1, 1]} : vector<8x32xf32> to vector<8x4xf32>
    %cst = arith.constant dense<0.000000e+00> : vector<8x8xf32>
    %13 = tpu.matmul %10, %11, %cst {dimension_numbers = #tpu.dot_dimension_numbers<[1], [1], [0], [0], [0, 0, 1, 0], [], []>} : vector<8x4xf32>, vector<8x4xf32>, vector<8x8xf32> -> vector<8x8xf32>
    %cst_5 = arith.constant dense<0xFF800000> : vector<8xf32>
    %14 = vector.multi_reduction <maximumf>, %13, %cst_5 [1] : vector<8x8xf32> to vector<8xf32>
    %15 = vector.shape_cast %14 : vector<8xf32> to vector<8x1xf32>
    %16 = vector.broadcast %15 : vector<8x1xf32> to vector<8x8xf32>
    %17 = arith.subf %13, %16 : vector<8x8xf32>
    %18 = math.exp %17 : vector<8x8xf32>
    %cst_6 = arith.constant dense<0.000000e+00> : vector<8xf32>
    %19 = vector.multi_reduction <add>, %18, %cst_6 [1] : vector<8x8xf32> to vector<8xf32>
    %20 = vector.shape_cast %19 : vector<8xf32> to vector<8x1xf32>
    %21 = tpu.reciprocal %20 {approx = true} : vector<8x1xf32> -> vector<8x1xf32>
    %22 = vector.broadcast %21 : vector<8x1xf32> to vector<8x8xf32>
    %23 = arith.mulf %18, %22 : vector<8x8xf32>
    %cst_7 = arith.constant dense<0.000000e+00> : vector<8x4xf32>
    %24 = tpu.matmul %23, %12, %cst_7 {dimension_numbers = #tpu.dot_dimension_numbers<[1], [0], [0], [1], [0, 0, 1, 1], [], []>} : vector<8x8xf32>, vector<8x4xf32>, vector<8x4xf32> -> vector<8x4xf32>
    %25 = vector.extract_strided_slice %5 {offsets = [0, 4], sizes = [8, 4], strides = [1, 1]} : vector<8x32xf32> to vector<8x4xf32>
    %26 = vector.extract_strided_slice %7 {offsets = [0, 4], sizes = [8, 4], strides = [1, 1]} : vector<8x32xf32> to vector<8x4xf32>
    %27 = vector.extract_strided_slice %9 {offsets = [0, 4], sizes = [8, 4], strides = [1, 1]} : vector<8x32xf32> to vector<8x4xf32>
    %cst_8 = arith.constant dense<0.000000e+00> : vector<8x8xf32>
    %28 = tpu.matmul %25, %26, %cst_8 {dimension_numbers = #tpu.dot_dimension_numbers<[1], [1], [0], [0], [0, 0, 1, 0], [], []>} : vector<8x4xf32>, vector<8x4xf32>, vector<8x8xf32> -> vector<8x8xf32>
    %cst_9 = arith.constant dense<0xFF800000> : vector<8xf32>
    %29 = vector.multi_reduction <maximumf>, %28, %cst_9 [1] : vector<8x8xf32> to vector<8xf32>
    %30 = vector.shape_cast %29 : vector<8xf32> to vector<8x1xf32>
    %31 = vector.broadcast %30 : vector<8x1xf32> to vector<8x8xf32>
    %32 = arith.subf %28, %31 : vector<8x8xf32>
    %33 = math.exp %32 : vector<8x8xf32>
    %cst_10 = arith.constant dense<0.000000e+00> : vector<8xf32>
    %34 = vector.multi_reduction <add>, %33, %cst_10 [1] : vector<8x8xf32> to vector<8xf32>
    %35 = vector.shape_cast %34 : vector<8xf32> to vector<8x1xf32>
    %36 = tpu.reciprocal %35 {approx = true} : vector<8x1xf32> -> vector<8x1xf32>
    %37 = vector.broadcast %36 : vector<8x1xf32> to vector<8x8xf32>
    %38 = arith.mulf %33, %37 : vector<8x8xf32>
    %cst_11 = arith.constant dense<0.000000e+00> : vector<8x4xf32>
    %39 = tpu.matmul %38, %27, %cst_11 {dimension_numbers = #tpu.dot_dimension_numbers<[1], [0], [0], [1], [0, 0, 1, 1], [], []>} : vector<8x8xf32>, vector<8x4xf32>, vector<8x4xf32> -> vector<8x4xf32>
    %40 = vector.extract_strided_slice %5 {offsets = [0, 8], sizes = [8, 4], strides = [1, 1]} : vector<8x32xf32> to vector<8x4xf32>
    %41 = vector.extract_strided_slice %7 {offsets = [0, 8], sizes = [8, 4], strides = [1, 1]} : vector<8x32xf32> to vector<8x4xf32>
    %42 = vector.extract_strided_slice %9 {offsets = [0, 8], sizes = [8, 4], strides = [1, 1]} : vector<8x32xf32> to vector<8x4xf32>
    %cst_12 = arith.constant dense<0.000000e+00> : vector<8x8xf32>
    %43 = tpu.matmul %40, %41, %cst_12 {dimension_numbers = #tpu.dot_dimension_numbers<[1], [1], [0], [0], [0, 0, 1, 0], [], []>} : vector<8x4xf32>, vector<8x4xf32>, vector<8x8xf32> -> vector<8x8xf32>
    %cst_13 = arith.constant dense<0xFF800000> : vector<8xf32>
    %44 = vector.multi_reduction <maximumf>, %43, %cst_13 [1] : vector<8x8xf32> to vector<8xf32>
    %45 = vector.shape_cast %44 : vector<8xf32> to vector<8x1xf32>
    %46 = vector.broadcast %45 : vector<8x1xf32> to vector<8x8xf32>
    %47 = arith.subf %43, %46 : vector<8x8xf32>
    %48 = math.exp %47 : vector<8x8xf32>
    %cst_14 = arith.constant dense<0.000000e+00> : vector<8xf32>
    %49 = vector.multi_reduction <add>, %48, %cst_14 [1] : vector<8x8xf32> to vector<8xf32>
    %50 = vector.shape_cast %49 : vector<8xf32> to vector<8x1xf32>
    %51 = tpu.reciprocal %50 {approx = true} : vector<8x1xf32> -> vector<8x1xf32>
    %52 = vector.broadcast %51 : vector<8x1xf32> to vector<8x8xf32>
    %53 = arith.mulf %48, %52 : vector<8x8xf32>
    %cst_15 = arith.constant dense<0.000000e+00> : vector<8x4xf32>
    %54 = tpu.matmul %53, %42, %cst_15 {dimension_numbers = #tpu.dot_dimension_numbers<[1], [0], [0], [1], [0, 0, 1, 1], [], []>} : vector<8x8xf32>, vector<8x4xf32>, vector<8x4xf32> -> vector<8x4xf32>
    %55 = vector.extract_strided_slice %5 {offsets = [0, 12], sizes = [8, 4], strides = [1, 1]} : vector<8x32xf32> to vector<8x4xf32>
    %56 = vector.extract_strided_slice %7 {offsets = [0, 12], sizes = [8, 4], strides = [1, 1]} : vector<8x32xf32> to vector<8x4xf32>
    %57 = vector.extract_strided_slice %9 {offsets = [0, 12], sizes = [8, 4], strides = [1, 1]} : vector<8x32xf32> to vector<8x4xf32>
    %cst_16 = arith.constant dense<0.000000e+00> : vector<8x8xf32>
    %58 = tpu.matmul %55, %56, %cst_16 {dimension_numbers = #tpu.dot_dimension_numbers<[1], [1], [0], [0], [0, 0, 1, 0], [], []>} : vector<8x4xf32>, vector<8x4xf32>, vector<8x8xf32> -> vector<8x8xf32>
    %cst_17 = arith.constant dense<0xFF800000> : vector<8xf32>
    %59 = vector.multi_reduction <maximumf>, %58, %cst_17 [1] : vector<8x8xf32> to vector<8xf32>
    %60 = vector.shape_cast %59 : vector<8xf32> to vector<8x1xf32>
    %61 = vector.broadcast %60 : vector<8x1xf32> to vector<8x8xf32>
    %62 = arith.subf %58, %61 : vector<8x8xf32>
    %63 = math.exp %62 : vector<8x8xf32>
    %cst_18 = arith.constant dense<0.000000e+00> : vector<8xf32>
    %64 = vector.multi_reduction <add>, %63, %cst_18 [1] : vector<8x8xf32> to vector<8xf32>
    %65 = vector.shape_cast %64 : vector<8xf32> to vector<8x1xf32>
    %66 = tpu.reciprocal %65 {approx = true} : vector<8x1xf32> -> vector<8x1xf32>
    %67 = vector.broadcast %66 : vector<8x1xf32> to vector<8x8xf32>
    %68 = arith.mulf %63, %67 : vector<8x8xf32>
    %cst_19 = arith.constant dense<0.000000e+00> : vector<8x4xf32>
    %69 = tpu.matmul %68, %57, %cst_19 {dimension_numbers = #tpu.dot_dimension_numbers<[1], [0], [0], [1], [0, 0, 1, 1], [], []>} : vector<8x8xf32>, vector<8x4xf32>, vector<8x4xf32> -> vector<8x4xf32>
    %70 = vector.extract_strided_slice %5 {offsets = [0, 16], sizes = [8, 4], strides = [1, 1]} : vector<8x32xf32> to vector<8x4xf32>
    %71 = vector.extract_strided_slice %7 {offsets = [0, 16], sizes = [8, 4], strides = [1, 1]} : vector<8x32xf32> to vector<8x4xf32>
    %72 = vector.extract_strided_slice %9 {offsets = [0, 16], sizes = [8, 4], strides = [1, 1]} : vector<8x32xf32> to vector<8x4xf32>
    %cst_20 = arith.constant dense<0.000000e+00> : vector<8x8xf32>
    %73 = tpu.matmul %70, %71, %cst_20 {dimension_numbers = #tpu.dot_dimension_numbers<[1], [1], [0], [0], [0, 0, 1, 0], [], []>} : vector<8x4xf32>, vector<8x4xf32>, vector<8x8xf32> -> vector<8x8xf32>
    %cst_21 = arith.constant dense<0xFF800000> : vector<8xf32>
    %74 = vector.multi_reduction <maximumf>, %73, %cst_21 [1] : vector<8x8xf32> to vector<8xf32>
    %75 = vector.shape_cast %74 : vector<8xf32> to vector<8x1xf32>
    %76 = vector.broadcast %75 : vector<8x1xf32> to vector<8x8xf32>
    %77 = arith.subf %73, %76 : vector<8x8xf32>
    %78 = math.exp %77 : vector<8x8xf32>
    %cst_22 = arith.constant dense<0.000000e+00> : vector<8xf32>
    %79 = vector.multi_reduction <add>, %78, %cst_22 [1] : vector<8x8xf32> to vector<8xf32>
    %80 = vector.shape_cast %79 : vector<8xf32> to vector<8x1xf32>
    %81 = tpu.reciprocal %80 {approx = true} : vector<8x1xf32> -> vector<8x1xf32>
    %82 = vector.broadcast %81 : vector<8x1xf32> to vector<8x8xf32>
    %83 = arith.mulf %78, %82 : vector<8x8xf32>
    %cst_23 = arith.constant dense<0.000000e+00> : vector<8x4xf32>
    %84 = tpu.matmul %83, %72, %cst_23 {dimension_numbers = #tpu.dot_dimension_numbers<[1], [0], [0], [1], [0, 0, 1, 1], [], []>} : vector<8x8xf32>, vector<8x4xf32>, vector<8x4xf32> -> vector<8x4xf32>
    %85 = vector.extract_strided_slice %5 {offsets = [0, 20], sizes = [8, 4], strides = [1, 1]} : vector<8x32xf32> to vector<8x4xf32>
    %86 = vector.extract_strided_slice %7 {offsets = [0, 20], sizes = [8, 4], strides = [1, 1]} : vector<8x32xf32> to vector<8x4xf32>
    %87 = vector.extract_strided_slice %9 {offsets = [0, 20], sizes = [8, 4], strides = [1, 1]} : vector<8x32xf32> to vector<8x4xf32>
    %cst_24 = arith.constant dense<0.000000e+00> : vector<8x8xf32>
    %88 = tpu.matmul %85, %86, %cst_24 {dimension_numbers = #tpu.dot_dimension_numbers<[1], [1], [0], [0], [0, 0, 1, 0], [], []>} : vector<8x4xf32>, vector<8x4xf32>, vector<8x8xf32> -> vector<8x8xf32>
    %cst_25 = arith.constant dense<0xFF800000> : vector<8xf32>
    %89 = vector.multi_reduction <maximumf>, %88, %cst_25 [1] : vector<8x8xf32> to vector<8xf32>
    %90 = vector.shape_cast %89 : vector<8xf32> to vector<8x1xf32>
    %91 = vector.broadcast %90 : vector<8x1xf32> to vector<8x8xf32>
    %92 = arith.subf %88, %91 : vector<8x8xf32>
    %93 = math.exp %92 : vector<8x8xf32>
    %cst_26 = arith.constant dense<0.000000e+00> : vector<8xf32>
    %94 = vector.multi_reduction <add>, %93, %cst_26 [1] : vector<8x8xf32> to vector<8xf32>
    %95 = vector.shape_cast %94 : vector<8xf32> to vector<8x1xf32>
    %96 = tpu.reciprocal %95 {approx = true} : vector<8x1xf32> -> vector<8x1xf32>
    %97 = vector.broadcast %96 : vector<8x1xf32> to vector<8x8xf32>
    %98 = arith.mulf %93, %97 : vector<8x8xf32>
    %cst_27 = arith.constant dense<0.000000e+00> : vector<8x4xf32>
    %99 = tpu.matmul %98, %87, %cst_27 {dimension_numbers = #tpu.dot_dimension_numbers<[1], [0], [0], [1], [0, 0, 1, 1], [], []>} : vector<8x8xf32>, vector<8x4xf32>, vector<8x4xf32> -> vector<8x4xf32>
    %100 = vector.extract_strided_slice %5 {offsets = [0, 24], sizes = [8, 4], strides = [1, 1]} : vector<8x32xf32> to vector<8x4xf32>
    %101 = vector.extract_strided_slice %7 {offsets = [0, 24], sizes = [8, 4], strides = [1, 1]} : vector<8x32xf32> to vector<8x4xf32>
    %102 = vector.extract_strided_slice %9 {offsets = [0, 24], sizes = [8, 4], strides = [1, 1]} : vector<8x32xf32> to vector<8x4xf32>
    %cst_28 = arith.constant dense<0.000000e+00> : vector<8x8xf32>
    %103 = tpu.matmul %100, %101, %cst_28 {dimension_numbers = #tpu.dot_dimension_numbers<[1], [1], [0], [0], [0, 0, 1, 0], [], []>} : vector<8x4xf32>, vector<8x4xf32>, vector<8x8xf32> -> vector<8x8xf32>
    %cst_29 = arith.constant dense<0xFF800000> : vector<8xf32>
    %104 = vector.multi_reduction <maximumf>, %103, %cst_29 [1] : vector<8x8xf32> to vector<8xf32>
    %105 = vector.shape_cast %104 : vector<8xf32> to vector<8x1xf32>
    %106 = vector.broadcast %105 : vector<8x1xf32> to vector<8x8xf32>
    %107 = arith.subf %103, %106 : vector<8x8xf32>
    %108 = math.exp %107 : vector<8x8xf32>
    %cst_30 = arith.constant dense<0.000000e+00> : vector<8xf32>
    %109 = vector.multi_reduction <add>, %108, %cst_30 [1] : vector<8x8xf32> to vector<8xf32>
    %110 = vector.shape_cast %109 : vector<8xf32> to vector<8x1xf32>
    %111 = tpu.reciprocal %110 {approx = true} : vector<8x1xf32> -> vector<8x1xf32>
    %112 = vector.broadcast %111 : vector<8x1xf32> to vector<8x8xf32>
    %113 = arith.mulf %108, %112 : vector<8x8xf32>
    %cst_31 = arith.constant dense<0.000000e+00> : vector<8x4xf32>
    %114 = tpu.matmul %113, %102, %cst_31 {dimension_numbers = #tpu.dot_dimension_numbers<[1], [0], [0], [1], [0, 0, 1, 1], [], []>} : vector<8x8xf32>, vector<8x4xf32>, vector<8x4xf32> -> vector<8x4xf32>
    %115 = vector.extract_strided_slice %5 {offsets = [0, 28], sizes = [8, 4], strides = [1, 1]} : vector<8x32xf32> to vector<8x4xf32>
    %116 = vector.extract_strided_slice %7 {offsets = [0, 28], sizes = [8, 4], strides = [1, 1]} : vector<8x32xf32> to vector<8x4xf32>
    %117 = vector.extract_strided_slice %9 {offsets = [0, 28], sizes = [8, 4], strides = [1, 1]} : vector<8x32xf32> to vector<8x4xf32>
    %cst_32 = arith.constant dense<0.000000e+00> : vector<8x8xf32>
    %118 = tpu.matmul %115, %116, %cst_32 {dimension_numbers = #tpu.dot_dimension_numbers<[1], [1], [0], [0], [0, 0, 1, 0], [], []>} : vector<8x4xf32>, vector<8x4xf32>, vector<8x8xf32> -> vector<8x8xf32>
    %cst_33 = arith.constant dense<0xFF800000> : vector<8xf32>
    %119 = vector.multi_reduction <maximumf>, %118, %cst_33 [1] : vector<8x8xf32> to vector<8xf32>
    %120 = vector.shape_cast %119 : vector<8xf32> to vector<8x1xf32>
    %121 = vector.broadcast %120 : vector<8x1xf32> to vector<8x8xf32>
    %122 = arith.subf %118, %121 : vector<8x8xf32>
    %123 = math.exp %122 : vector<8x8xf32>
    %cst_34 = arith.constant dense<0.000000e+00> : vector<8xf32>
    %124 = vector.multi_reduction <add>, %123, %cst_34 [1] : vector<8x8xf32> to vector<8xf32>
    %125 = vector.shape_cast %124 : vector<8xf32> to vector<8x1xf32>
    %126 = tpu.reciprocal %125 {approx = true} : vector<8x1xf32> -> vector<8x1xf32>
    %127 = vector.broadcast %126 : vector<8x1xf32> to vector<8x8xf32>
    %128 = arith.mulf %123, %127 : vector<8x8xf32>
    %cst_35 = arith.constant dense<0.000000e+00> : vector<8x4xf32>
    %129 = tpu.matmul %128, %117, %cst_35 {dimension_numbers = #tpu.dot_dimension_numbers<[1], [0], [0], [1], [0, 0, 1, 1], [], []>} : vector<8x8xf32>, vector<8x4xf32>, vector<8x4xf32> -> vector<8x4xf32>
    %130 = tpu.concatenate %24, %39, %54, %69, %84, %99, %114, %129 in 1 : vector<8x4xf32>, vector<8x4xf32>, vector<8x4xf32>, vector<8x4xf32>, vector<8x4xf32>, vector<8x4xf32>, vector<8x4xf32>, vector<8x4xf32> -> vector<8x32xf32>
    %c0_36 = arith.constant 0 : index
    %c0_37 = arith.constant 0 : index
    %c0_38 = arith.constant 0 : index
    %131 = vector.load %arg3[%c0_36, %c0_37, %c0_38] : memref<1x8x32xf32, #tpu.memory_space<vmem>>, vector<1x8x32xf32>
    %132 = vector.shape_cast %131 : vector<1x8x32xf32> to vector<8x32xf32>
    %133 = vector.shape_cast %130 : vector<8x32xf32> to vector<1x8x32xf32>
    tpu.vector_store %arg3[%c0_36, %c0_37, %c0_38], %133 {strides = array<i32>} : memref<1x8x32xf32, #tpu.memory_space<vmem>>, vector<1x8x32xf32>,
    return
  }
  func.func @transform_0(%arg0: i32, %arg1: i32) -> (i32, i32, i32) {
    %c0_i32 = arith.constant 0 : i32
    %c0_i32_0 = arith.constant 0 : i32
    %c0_i32_1 = arith.constant 0 : i32
    return %arg0, %c0_i32, %c0_i32_0 : i32, i32, i32
  }
  func.func @transform_1(%arg0: i32, %arg1: i32) -> (i32, i32, i32) {
    %c0_i32 = arith.constant 0 : i32
    %c0_i32_0 = arith.constant 0 : i32
    return %arg0, %arg1, %c0_i32 : i32, i32, i32
  }
}

module attributes {stable_mosaic.version = 11 : i64} {
  func.func @_matmul_bias_1k_kernel(%arg0: i32, %arg1: i32, %arg2: memref<16x32xf32, #tpu.memory_space<vmem>>, %arg3: memref<32x32xf32, #tpu.memory_space<vmem>>, %arg4: memref<1x32xf32, #tpu.memory_space<vmem>>, %arg5: memref<16x32xf32, #tpu.memory_space<vmem>>) attributes {dimension_semantics = [#tpu.dimension_semantics<parallel>, #tpu.dimension_semantics<parallel>], iteration_bounds = array<i64: 1, 1>, scalar_prefetch = 0 : i64, scratch_operands = 0 : i64, tpu.core_type = #tpu.core_type<tc>, window_params = [{transform_indices = @transform_0, window_bounds = array<i64: 16, 32>}, {transform_indices = @transform_1, window_bounds = array<i64: 32, 32>}, {transform_indices = @transform_2, window_bounds = array<i64: 1, 32>}, {transform_indices = @transform_3, window_bounds = array<i64: 16, 32>}]} {
    %c0 = arith.constant 0 : index
    %c0_0 = arith.constant 0 : index
    %0 = vector.load %arg2[%c0, %c0_0] : memref<16x32xf32, #tpu.memory_space<vmem>>, vector<16x32xf32>
    %c0_1 = arith.constant 0 : index
    %c0_2 = arith.constant 0 : index
    %1 = vector.load %arg3[%c0_1, %c0_2] : memref<32x32xf32, #tpu.memory_space<vmem>>, vector<32x32xf32>
    %cst = arith.constant dense<0.000000e+00> : vector<16x32xf32>
    %2 = tpu.matmul %0, %1, %cst {dimension_numbers = #tpu.dot_dimension_numbers<[1], [0], [0], [1], [0, 0, 1, 1], [], []>} : vector<16x32xf32>, vector<32x32xf32>, vector<16x32xf32> -> vector<16x32xf32>
    %c0_3 = arith.constant 0 : index
    %c0_4 = arith.constant 0 : index
    %3 = vector.load %arg4[%c0_3, %c0_4] : memref<1x32xf32, #tpu.memory_space<vmem>>, vector<1x32xf32>
    %4 = vector.broadcast %3 : vector<1x32xf32> to vector<16x32xf32>
    %5 = arith.addf %2, %4 : vector<16x32xf32>
    %c0_5 = arith.constant 0 : index
    %c0_6 = arith.constant 0 : index
    %6 = vector.load %arg5[%c0_5, %c0_6] : memref<16x32xf32, #tpu.memory_space<vmem>>, vector<16x32xf32>
    tpu.vector_store %arg5[%c0_5, %c0_6], %5 {strides = array<i32>} : memref<16x32xf32, #tpu.memory_space<vmem>>, vector<16x32xf32>,
    return
  }
  func.func @transform_0(%arg0: i32, %arg1: i32) -> (i32, i32) {
    %c0_i32 = arith.constant 0 : i32
    %c0_i32_0 = arith.constant 0 : i32
    return %arg0, %c0_i32 : i32, i32
  }
  func.func @transform_1(%arg0: i32, %arg1: i32) -> (i32, i32) {
    %c0_i32 = arith.constant 0 : i32
    %c0_i32_0 = arith.constant 0 : i32
    return %c0_i32, %arg1 : i32, i32
  }
  func.func @transform_2(%arg0: i32, %arg1: i32) -> (i32, i32) {
    %c0_i32 = arith.constant 0 : i32
    %c0_i32_0 = arith.constant 0 : i32
    return %c0_i32, %arg1 : i32, i32
  }
  func.func @transform_3(%arg0: i32, %arg1: i32) -> (i32, i32) {
    %c0_i32 = arith.constant 0 : i32
    return %arg0, %arg1 : i32, i32
  }
}

</mosaic_0001>

<bundles_post_ra>
// kernel: attention_forward.3
= control target key start
LH: loop header
LB: loop body
LE: loop exit
PB: predicated region body
PF: predicated region fallthrough
CT: control target
= control target key end

     0   :  { %7 = vsyncpa [#allocation3], 0  ;;  %s318_s0 = inlined_call_operand.hbm [shape: f32[16,32], index: 0, kind: input, shape index: {}]   ;;  %s319_s1 = inlined_call_operand.hbm [shape: f32[32,96], index: 1, kind: input, shape index: {}]   ;;  %s320_s2 = inlined_call_operand.hbm [shape: f32[16,96], index: 2, kind: output, shape index: {}]  }
   0x1   :  { %8 = vsyncpa [#allocation6], 0 }
   0x2   :  { %9 = vsyncpa [#allocation4], 0  ;;  %s253_s9 = smov [#allocation2]   ;;  %s181_s13 = scalar_lea.hbm %s318_s0, 256 }
   0x3   :  { %s15_s10 = sshll.u32 %s253_s9, 4  ;;  %p182_p0 = scmp.ne.s32.totalorder %s318_s0, %s181_s13  ;;  %s16_s10 = int_to_ptr.vmem [resolvable:$true] %s15_s10 }
   0x4   :  { %p185_p1 = scmp.lt.u32.totalorder %s181_s13, %s318_s0 }
   0x6   :  { %p187_p2 = pnand %p185_p1, %p182_p0 }
   0x8   :  { %190 = shalt.err (!%p187_p2)
}
   0x9   :  { %s191_s18 = scalar_lea.vmem %s16_s10, 256  ;;  %p196_p4 = scmp.lt.s32.totalorder %s16_s10, %s16_s10 }
   0xa   :  { %p192_p3 = scmp.ne.s32.totalorder %s16_s10, %s191_s18  ;;  %p197_p5 = scmp.lt.s32.totalorder %s191_s18, %s191_s18 }
   0xc   :  { %p198_p6 = por %p197_p5, %p196_p4 }
   0xe   :  { %p199_p7 = pnand %p198_p6, %p192_p3 }
  0x10   :  { %202 = shalt.err (!%p199_p7)
}
  0x11   :  { %s254_s19 = smov 128   ;;  %s255_s20 = smov 8  }
  0x12   :  { %21 = dma.hbm_to_vmem [thread:$0]  %s318_s0, 256, %s16_s10, [#allocation3], %s254_s19, %s254_s19, %s255_s20  }
  0x13   :  { %s256_s23 = smov [#allocation5]   ;;  %s203_s27 = scalar_lea.hbm %s319_s1, 512 }
  0x14   :  { %s27_s24 = sshll.u32 %s256_s23, 4  ;;  %p204_p8 = scmp.ne.s32.totalorder %s319_s1, %s203_s27  ;;  %s28_s24 = int_to_ptr.vmem [resolvable:$true] %s27_s24 }
  0x15   :  { %p207_p9 = scmp.lt.u32.totalorder %s203_s27, %s319_s1 }
  0x17   :  { %p209_p10 = pnand %p207_p9, %p204_p8 }
  0x19   :  { %212 = shalt.err (!%p209_p10)
}
  0x1a   :  { %s213_s4 = scalar_lea.vmem %s28_s24, 512  ;;  %p218_p12 = scmp.lt.s32.totalorder %s28_s24, %s28_s24 }
  0x1b   :  { %p214_p11 = scmp.ne.s32.totalorder %s28_s24, %s213_s4  ;;  %p219_p13 = scmp.lt.s32.totalorder %s213_s4, %s213_s4 }
  0x1d   :  { %p220_p0 = por %p219_p13, %p218_p12 }
  0x1f   :  { %p221_p1 = pnand %p220_p0, %p214_p11 }
  0x21   :  { %224 = shalt.err (!%p221_p1)
}
  0x22   :  { %33 = dma.hbm_to_vmem [thread:$0]  %s319_s1, 512, %s28_s24, [#allocation6], %s254_s19, %s254_s19, %s255_s20  }
  0x23   :  { %247 = dma.done.wait [#allocation3], 256  }
  0x24   :  { %248 = vsyncadd [#allocation3], 4294967040 }
  0x25   :  { %249 = dma.done.wait [#allocation6], 512  }
  0x26   :  { %250 = vsyncadd [#allocation6], 4294966784  ;;  %vm46_vm0 = vcmask 261120   ;;  %v42_v0 = vld [vmem:[#allocation5] sm:$0xff]  ;;  %v43_v1 = vld [vmem:[#allocation5 + $0x8] sm:$0xff]  ;;  %s257_s1 = smov [#allocation7]  }
  0x27   :  { %v44_v2 = vld [vmem:[#allocation5 + $0x10] sm:$0xff]  ;;  %v168_v3 = vpack.c.bf16 %v43_v1, %v42_v0  ;;  %v45_v4 = vld [vmem:[#allocation5 + $0x18] sm:$0xff]  ;;  %s136_s6 = sshll.u32 %s257_s1, 4  ;;  %vm128_vm1 = vcmask 785408   ;;  %s137_s6 = int_to_ptr.vmem [resolvable:$true] %s136_s6 }
  0x28   :  { %v40_v5 = vld [vmem:[#allocation2] sm:$0xff]  ;;  %v172_v6 = vpack.c.bf16 %v45_v4, %v44_v2  ;;  %v41_v7 = vld [vmem:[#allocation2 + $0x8] sm:$0xff]  ;;  %s225_s7 = scalar_lea.vmem %s137_s6, 256  ;;  %p230_p3 = scmp.lt.s32.totalorder %s137_s6, %s137_s6 }
  0x29   :  { %165 = vmatprep.mubr.msk.f32.mxu0 %vm46_vm0, %v40_v5  ;;  %169 = vmatprep.subr.bf16.mxu0 %v168_v3  ;;  %p226_p2 = scmp.ne.s32.totalorder %s137_s6, %s225_s7  ;;  %p231_p4 = scmp.lt.s32.totalorder %s225_s7, %s225_s7 }
  0x2a   :  { %171 = vmatpush3.bf16.msra.mxu0 %v168_v3 }
  0x2b   :  { %173 = vmatprep.subr.bf16.mxu0 %v172_v6  ;;  %p232_p5 = por %p231_p4, %p230_p3 }
  0x2d   :  { %p233_p6 = pnand %p232_p5, %p226_p2 }
  0x2e   :  { %175 = vmatpush3.bf16.msra.mxu0 %v172_v6 }
  0x31   :  { %166 = vmatmul.mubr.msk.f32.vlgmr.msra.gmra.mrb[0].mxu0 %vm46_vm0, %v41_v7 }
 0x104   :  { %v167_v8 = vpop.f32.mrb[0].mxu0 }
 0x105   :  { %130 = vst.msk [vmem:[#allocation7 + $0x8] sm:$0xff] %vm128_vm1, %v167_v8  ;;  %v119_v9 = vpop.f32.mrb[1].mxu0 }
 0x106   :  { %129 = vst.msk [vmem:[#allocation7] sm:$0xff] %vm128_vm1, %v119_v9 }
 0x107   :  { %236 = shalt.err (!%p233_p6)
}
 0x108   :  { %s237_s10 = scalar_lea.hbm %s320_s2, 256 }
 0x109   :  { %p238_p7 = scmp.ne.s32.totalorder %s320_s2, %s237_s10  ;;  %p241_p8 = scmp.lt.u32.totalorder %s237_s10, %s320_s2 }
 0x10b   :  { %p243_p9 = pnand %p241_p8, %p238_p7 }
 0x10d   :  { %246 = shalt.err (!%p243_p9)
}
 0x10e   :  { %142 = dma.vmem_to_hbm [thread:$0]  %s137_s6, 256, %s320_s2, [#allocation4], %s254_s19, %s254_s19, %s255_s20  }
 0x10f   :  { %251 = dma.done.wait [#allocation4], 256  }
 0x110   :  { %252 = vsyncadd [#allocation4], 4294967040 }
 0x111   :  { %146 = vsyncpa [#allocation3], 1 }
 0x112   :  { %147 = vsyncpa [#allocation6], 1 }
 0x113   :  { %148 = vsyncpa [#allocation4], 1 }

// kernel: attention_forward.5
= control target key start
LH: loop header
LB: loop body
LE: loop exit
PB: predicated region body
PF: predicated region fallthrough
CT: control target
= control target key end

     0   :  { %8 = vsyncpa [#allocation3], 0  ;;  %s391_s0 = inlined_call_operand.hbm [shape: f32[16,32], index: 0, kind: input, shape index: {}]   ;;  %s392_s1 = inlined_call_operand.hbm [shape: f32[32,32], index: 1, kind: input, shape index: {}]   ;;  %s393_s2 = inlined_call_operand.hbm [shape: f32[1,32], index: 2, kind: input, shape index: {}]   ;;  %s394_s3 = inlined_call_operand.hbm [shape: f32[16,32], index: 3, kind: output, shape index: {}]  }
   0x1   :  { %9 = vsyncpa [#allocation6], 0 }
   0x2   :  { %10 = vsyncpa [#allocation4], 0  ;;  %s297_s12 = smov [#allocation5]   ;;  %s298_s14 = smov [#allocation2]  }
   0x3   :  { %s28_s13 = sshll.u32 %s297_s12, 4  ;;  %s16_s15 = sshll.u32 %s298_s14, 4  ;;  %s29_s13 = int_to_ptr.vmem [resolvable:$true] %s28_s13  ;;  %s323_s15 = int_to_ptr.vmem [resolvable:$true] %s16_s15 }
   0x4   :  { %s203_s18 = scalar_lea.hbm %s392_s1, 512 }
   0x5   :  { %p204_p0 = scmp.ne.s32.totalorder %s392_s1, %s203_s18  ;;  %p207_p1 = scmp.lt.u32.totalorder %s203_s18, %s392_s1 }
   0x7   :  { %p209_p2 = pnand %p207_p1, %p204_p0 }
   0x9   :  { %212 = shalt.err (!%p209_p2)
}
   0xa   :  { %s213_s23 = scalar_lea.vmem %s29_s13, 512  ;;  %p218_p4 = scmp.lt.s32.totalorder %s29_s13, %s29_s13 }
   0xb   :  { %p214_p3 = scmp.ne.s32.totalorder %s29_s13, %s213_s23  ;;  %p219_p5 = scmp.lt.s32.totalorder %s213_s23, %s213_s23 }
   0xd   :  { %p220_p6 = por %p219_p5, %p218_p4 }
   0xf   :  { %p221_p7 = pnand %p220_p6, %p214_p3 }
  0x11   :  { %224 = shalt.err (!%p221_p7)
}
  0x12   :  { %s299_s24 = smov 128   ;;  %s300_s25 = smov 8  }
  0x13   :  { %34 = dma.hbm_to_vmem [thread:$0]  %s392_s1, 512, %s29_s13, [#allocation6], %s299_s24, %s299_s24, %s300_s25  }
  0x14   :  { %s225_s30 = scalar_lea.hbm %s391_s0, 256 }
  0x15   :  { %p226_p8 = scmp.ne.s32.totalorder %s391_s0, %s225_s30  ;;  %p229_p9 = scmp.lt.u32.totalorder %s225_s30, %s391_s0 }
  0x17   :  { %p231_p10 = pnand %p229_p9, %p226_p8 }
  0x19   :  { %234 = shalt.err (!%p231_p10)
}
  0x1a   :  { %s235_s8 = scalar_lea.vmem %s323_s15, 256  ;;  %p240_p12 = scmp.lt.s32.totalorder %s323_s15, %s323_s15 }
  0x1b   :  { %p236_p11 = scmp.ne.s32.totalorder %s323_s15, %s235_s8  ;;  %p241_p13 = scmp.lt.s32.totalorder %s235_s8, %s235_s8 }
  0x1d   :  { %p242_p0 = por %p241_p13, %p240_p12 }
  0x1f   :  { %p243_p1 = pnand %p242_p0, %p236_p11 }
  0x21   :  { %246 = shalt.err (!%p243_p1)
}
  0x22   :  { %22 = dma.hbm_to_vmem [thread:$0]  %s391_s0, 256, %s323_s15, [#allocation3], %s299_s24, %s299_s24, %s300_s25  }
  0x23   :  { %s301_s10 = smov [#allocation7]   ;;  %s247_s14 = scalar_lea.hbm %s393_s2, 16 }
  0x24   :  { %s41_s11 = sshll.u32 %s301_s10, 4  ;;  %p248_p2 = scmp.ne.s32.totalorder %s393_s2, %s247_s14  ;;  %s42_s11 = int_to_ptr.vmem [resolvable:$true] %s41_s11 }
  0x25   :  { %p251_p3 = scmp.lt.u32.totalorder %s247_s14, %s393_s2 }
  0x27   :  { %p253_p4 = pnand %p251_p3, %p248_p2 }
  0x29   :  { %256 = shalt.err (!%p253_p4)
}
  0x2a   :  { %s257_s20 = scalar_lea.vmem %s42_s11, 16  ;;  %s261_s0 = scalar_lea.vmem %s42_s11, 32 }
  0x2b   :  { %p258_p5 = scmp.ne.s32.totalorder %s42_s11, %s257_s20  ;;  %p262_p6 = scmp.lt.s32.totalorder %s42_s11, %s42_s11 }
  0x2c   :  { %p263_p7 = scmp.lt.s32.totalorder %s261_s0, %s257_s20 }
  0x2e   :  { %p264_p8 = por %p263_p7, %p262_p6 }
  0x30   :  { %p265_p9 = pnand %p264_p8, %p258_p5 }
  0x32   :  { %268 = shalt.err (!%p265_p9)
}
  0x33   :  { %44 = dma.hbm_to_vmem [thread:$0]  %s393_s2, 16, %s42_s11, [#allocation6]  }
  0x34   :  { %291 = dma.done.wait [#allocation3], 256  }
  0x35   :  { %292 = vsyncadd [#allocation3], 4294967040 }
  0x36   :  { %293 = dma.done.wait [#allocation6], 528  }
  0x37   :  { %294 = vsyncadd [#allocation6], 4294966768  ;;  %vm67_vm0 = vcmask 261120   ;;  %v56_v0 = vld [vmem:[#allocation5] sm:$0xff]  ;;  %v57_v1 = vld [vmem:[#allocation5 + $0x8] sm:$0xff]  ;;  %s302_s2 = smov [#allocation8]  }
  0x38   :  { %v58_v2 = vld [vmem:[#allocation5 + $0x10] sm:$0xff]  ;;  %v189_v3 = vpack.c.bf16 %v57_v1, %v56_v0  ;;  %v59_v4 = vld [vmem:[#allocation5 + $0x18] sm:$0xff]  ;;  %v169_v8 = vld [vmem:[#allocation7] ss:$0 sm:$0xff]  ;;  %s156_s22 = sshll.u32 %s302_s2, 4  ;;  %s157_s22 = int_to_ptr.vmem [resolvable:$true] %s156_s22 }
  0x39   :  { %v54_v5 = vld [vmem:[#allocation2] sm:$0xff]  ;;  %v193_v6 = vpack.c.bf16 %v59_v4, %v58_v2  ;;  %v55_v7 = vld [vmem:[#allocation2 + $0x8] sm:$0xff]  ;;  %s269_s23 = scalar_lea.vmem %s157_s22, 256  ;;  %p274_p11 = scmp.lt.s32.totalorder %s157_s22, %s157_s22 }
  0x3a   :  { %186 = vmatprep.mubr.msk.f32.mxu0 %vm67_vm0, %v54_v5  ;;  %190 = vmatprep.subr.bf16.mxu0 %v189_v3  ;;  %p270_p10 = scmp.ne.s32.totalorder %s157_s22, %s269_s23  ;;  %p275_p12 = scmp.lt.s32.totalorder %s269_s23, %s269_s23 }
  0x3b   :  { %192 = vmatpush3.bf16.msra.mxu0 %v189_v3 }
  0x3c   :  { %194 = vmatprep.subr.bf16.mxu0 %v193_v6  ;;  %p276_p13 = por %p275_p12, %p274_p11 }
  0x3e   :  { %p277_p0 = pnand %p276_p13, %p270_p10 }
  0x3f   :  { %196 = vmatpush3.bf16.msra.mxu0 %v193_v6 }
  0x42   :  { %187 = vmatmul.mubr.msk.f32.vlgmr.msra.gmra.mrb[0].mxu0 %vm67_vm0, %v55_v7 }
 0x115   :  { %v188_v9 = vpop.f32.mrb[0].mxu0 }
 0x116   :  { %v146_v10 = vadd.f32 %v188_v9, %v169_v8  ;;  %v140_v11 = vpop.f32.mrb[1].mxu0 }
 0x117   :  { %v141_v12 = vadd.f32 %v169_v8, %v140_v11 }
 0x118   :  { %150 = vst.msk [vmem:[#allocation8 + $0x8] sm:$0xff] %vm67_vm0, %v146_v10 }
 0x119   :  { %149 = vst.msk [vmem:[#allocation8] sm:$0xff] %vm67_vm0, %v141_v12 }
 0x11a   :  { %280 = shalt.err (!%p277_p0)
}
 0x11b   :  { %s281_s28 = scalar_lea.hbm %s394_s3, 256 }
 0x11c   :  { %p282_p1 = scmp.ne.s32.totalorder %s394_s3, %s281_s28  ;;  %p285_p2 = scmp.lt.u32.totalorder %s281_s28, %s394_s3 }
 0x11e   :  { %p287_p3 = pnand %p285_p2, %p282_p1 }
 0x120   :  { %290 = shalt.err (!%p287_p3)
}
 0x121   :  { %162 = dma.vmem_to_hbm [thread:$0]  %s157_s22, 256, %s394_s3, [#allocation4], %s299_s24, %s299_s24, %s300_s25  }
 0x122   :  { %295 = dma.done.wait [#allocation4], 256  }
 0x123   :  { %296 = vsyncadd [#allocation4], 4294967040 }
 0x124   :  { %166 = vsyncpa [#allocation3], 1 }
 0x125   :  { %167 = vsyncpa [#allocation6], 1 }
 0x126   :  { %168 = vsyncpa [#allocation4], 1 }

// kernel: attention_forward.4
= control target key start
LH: loop header
LB: loop body
LE: loop exit
PB: predicated region body
PF: predicated region fallthrough
CT: control target
= control target key end

     0   :  { %6 = vsyncpa [#allocation3], 0  ;;  %s2346_s0 = inlined_call_operand.hbm [shape: f32[2,8,96], index: 0, kind: input, shape index: {}]   ;;  %s2347_s1 = inlined_call_operand.hbm [shape: f32[2,8,32], index: 1, kind: output, shape index: {}]  }
   0x1   :  { %8 = vsyncpa [#allocation3 + $0x1], 0 }
   0x2   :  { %9 = vsyncpa [#allocation4], 0 }
   0x3   :  { %11 = vsyncpa [#allocation4 + $0x1], 0  ;;  %s2043_s6 = smov 0   ;;  %s2045_s7 = smov 0  }
   0x4   :  { %s2047_s8 = smov 0   ;;  %s2049_s9 = smov 0  }
   0x5   :  { %s2051_s10 = smov 0   ;;  %s2053_s11 = smov 0  }
   0x6 LB: > { %s1610_s12 = sadd.s32 4294967295, %s1997_s11   ;;  %s1611_s13 = sadd.s32 4294967294, %s1997_s11   ;;  %s1997_s11 = sphi %s2053_s11, %s17_s11   ;;  %s1993_s10 = sphi %s2051_s10, %s2363_s10   ;;  %s1989_s9 = sphi %s2049_s9, %s2362_s9   ;;  %s1985_s8 = sphi %s2047_s8, %s2361_s8   ;;  %s1981_s7 = sphi %s2045_s7, %s2360_s7   ;;  %s1977_s6 = sphi %s2043_s6, %s2359_s6  }
   0x7   : > { %s29_s14 = sadd.s32 1, %s1993_s10  ;;  %s36_s15 = sadd.s32 1, %s1985_s8 }
   0x8   : > { %p31_p0 = scmp.ge.s32.totalorder %s29_s14, 2  ;;  %p43_p1 = scmp.ne.s32.totalorder %s1985_s8, %s1981_s7 }
   0x9   : > { %p44_p2 = scmp.eq.s32.totalorder %s1997_s11, 0  ;;  %p49_p3 = scmp.ne.s32.totalorder %s1981_s7, %s1977_s6 }
   0xa   : > { %s2365_s14 = smov (%p31_p0, %s29_s14), 0  ;;  %p50_p5 = scmp.eq.s32.totalorder %s1610_s12, 0 }
   0xb   : > { %p2084_p4 = por %p44_p2, %p43_p1  ;;  %s33_s17 = ssub.s32 %s1993_s10, %s2365_s14 }
   0xc   : > { %p75_p6 = scmp.eq.s32.totalorder %s1610_s12, 1  ;;  %p34_p7 = scmp.eq.s32.totalorder %s33_s17, 0 }
   0xd   : > { %p2090_p8 = por %p50_p5, %p49_p3  ;;  %p81_p10 = scmp.eq.s32.totalorder %s1611_s13, 1 }
   0xe   : > { %p2094_p9 = por %p75_p6, %p43_p1  ;;  %p1771_p13 = scmp.lt.s32.totalorder %s1997_s11, 2 }
   0xf   : > { %s2099_s20 = scalar_select %p34_p7, %s1985_s8, %s36_s15  }
  0x10   : > { %s2351_s19 = scalar_select %p2094_p9, 1, 0 }
  0x11   : > { %p2101_p11 = por %p81_p10, %p49_p3  ;;  %s101_s22 = sand.u32 1, %s1985_s8  }
  0x12   : > { %s1614_s23 = sshll.u32 %s101_s22, 3  ;;  %s1615_s24 = sshll.u32 %s1993_s10, 7 }
  0x13   : > { %s2352_s21 = scalar_select %p2101_p11, 1, 0 }
  0x14   : > { %s2112_s27 = scalar_lea.hbm %s2346_s0, %s1615_s24  ;;  %s105_s28 = scalar_lea.vmem [#allocation2], %s1614_s23 }
  0x15   : > { %s112_s29 = sshll.u32 %s105_s28, 4  ;;  %p2118_p0 = pnand %p1771_p13, %p2084_p4  ;;  %s2114_s29 = int_to_ptr.vmem [resolvable:$true] %s112_s29 }
  0x16   : > { %s102_s2 = scalar_lea.sflag [#allocation3], %s101_s22  ;;  %s1885_s3 = scalar_lea.hbm %s2112_s27, 128 }
  0x17   : > { %p1886_p3 = scmp.ne.s32.totalorder %s2112_s27, %s1885_s3  ;;  %p1887_p5 = pneg %p2118_p0 }
  0x18   : > { %s1890_s12 = scalar_lea.hbm %s2346_s0, 256  ;;  %p1891_p4 = scmp.lt.u32.totalorder %s2112_s27, %s2346_s0 }
  0x19   : > { %p1888_p6 = pnand %p1887_p5, %p1886_p3  ;;  %p1892_p10 = scmp.lt.u32.totalorder %s1890_s12, %s1885_s3 }
  0x1a   : > { %p1894_p12 = scmp.lt.u32.totalorder %s1885_s3, %s2112_s27 }
  0x1b   : > { %p1889_p7 = pneg %p1888_p6  ;;  %p1893_p13 = por %p1892_p10, %p1891_p4 }
  0x1d   : > { %p1895_p1 = por %p1894_p12, %p1893_p13 }
  0x1f   : > { %p1896_p2 = pnand %p1895_p1, %p1889_p7 }
  0x21   : > { %1899 = shalt.err (!%p1896_p2)
}
  0x22   : > { %s1900_s16 = scalar_lea.vmem %s2114_s29, 128  ;;  %s1999_s17 = smov [#allocation2]  }
  0x23   : > { %p1901_p3 = scmp.ne.s32.totalorder %s2114_s29, %s1900_s16  ;;  %s1905_s22 = sshll.u32 %s1999_s17, 4  ;;  %s1906_s22 = int_to_ptr.vmem [resolvable:$false] %s1905_s22 }
  0x24   : > { %s1907_s23 = scalar_lea.vmem %s1906_s22, 256  ;;  %p1908_p9 = scmp.lt.s32.totalorder %s2114_s29, %s1906_s22 }
  0x25   : > { %p1903_p6 = pnand %p1901_p3, %p1887_p5  ;;  %p1909_p4 = scmp.lt.s32.totalorder %s1907_s23, %s1900_s16 }
  0x27   : > { %p1904_p11 = pneg %p1903_p6  ;;  %p1910_p10 = por %p1909_p4, %p1908_p9 }
  0x29   : > { %p1911_p12 = pnand %p1910_p10, %p1904_p11 }
  0x2b   : > { %1914 = shalt.err (!%p1911_p12)
}
  0x2c   : > { %1766 = dma.hbm_to_vmem [thread:$0]  (!%p2118_p0), %s2112_s27, 128, %s2114_s29, %s102_s2  }
  0x2d   : > { %p2354_p1 = scmp.lt.s32.totalorder %s1997_s11, 3  ;;  %p2355_p2 = scmp.ge.s32.totalorder %s1997_s11, 1 }
  0x2f   : > { %p118_p5 = pnand %p2355_p2, %p2354_p1 }
  0x30   : > { %s2154_s24 = sand.u32 (!%p118_p5), 1, %s1981_s7  }
  0x31   : > { %121 = sbr.rel (%p118_p5) target bundleno = 1645 (0x66d), region = 24  ;;  %s1617_s25 = sshll.u32 (!%p118_p5), %s2154_s24, 3 }
  0x32   : > { %s124_s26 = scalar_lea.sflag (!%p118_p5), [#allocation3], %s2154_s24  ;;  %s127_s28 = scalar_lea.vmem (!%p118_p5), [#allocation2], %s1617_s25 }
  0x38   : > { %1968 = dma.done.wait (%p2090_p8), %s124_s26, 128  }
  0x39   : > { %1970 = vsyncadd (%p2090_p8), %s124_s26, 4294967168  ;;  %v2000_v0 = vmov 0.0   ;;  %vm2001_vm0 = vmmov 0   ;;  %v2170_v1 = vld [vmem:[%s127_s28] sm:$0xff]  ;;  %s2002_s27 = smov 96   ;;  %vm153_vm1 = vcmask 31744  }
  0x3a   : > { %1679 = vmatprep.subr.mxu0 %v2000_v0  ;;  %1681 = vmatprep.mubr.msk.f32.mxu0 %vm2001_vm0, %v2000_v0  ;;  %s2003_s18 = smov 64   ;;  %s2004_s29 = smov 92   ;;  %vm229_vm2 = vcmask 64512   ;;  %vm1502_vm3 = vcmask 97280   ;;  %vm1504_vm4 = vcmask 130048   ;;  %vm1506_vm5 = vcmask 162816  }
  0x3b   : > { %1684 = vmatprep.subr.mxu1 %v2000_v0  ;;  %1686 = vmatprep.mubr.msk.f32.mxu1 %vm2001_vm0, %v2000_v0  ;;  %s2005_s30 = smov 124   ;;  %s2006_s2 = smov 88   ;;  %vm1508_vm6 = vcmask 195584   ;;  %vm1510_vm7 = vcmask 228352   ;;  %vm1512_vm8 = vcmask 261120  }
  0x3c   : > { %151 = vrot.lane.b32.xlu0 %v2170_v1, %s2002_s27  ;;  %241 = vrot.lane.b32.xlu1 %v2170_v1, %s2003_s18  ;;  %s2007_s3 = smov 120   ;;  %s2008_s4 = smov 116  }
  0x3d   : > { %s2009_s5 = smov 84   ;;  %s2010_s12 = smov 72  }
  0x3e   : > { %s2011_s13 = smov 68   ;;  %s2012_s15 = smov 80  }
  0x3f   : > { %s2013_s16 = smov 112   ;;  %s2014_s17 = smov 76  }
  0x40   : > { %319 = vrot.lane.b32.xlu1 %v2170_v1, %s2004_s29  ;;  %s2015_s22 = smov 108   ;;  %s2016_s23 = smov 104  }
  0x41   : > { %s2017_s26 = smov 100   ;;  %s2018_s28 = smov 60  }
  0x42   : > { %s2019_s27 = smov 56   ;;  %s2020_s18 = smov 52  }
  0x43   : > { %s2021_s29 = smov 48   ;;  %p2356_p9 = scmp.ne.s32.totalorder %s2351_s19, 0 }
  0x44   : > { %317 = vrot.lane.b32.xlu1 %v2170_v1, %s2005_s30  ;;  %s2022_s30 = smov 44  }
  0x48   : > { %484 = vrot.lane.b32.xlu1 %v2170_v1, %s2006_s2  ;;  %s2023_s2 = smov 40  }
  0x4c   : > { %482 = vrot.lane.b32.xlu1 %v2170_v1, %s2007_s3  ;;  %s2024_s3 = smov 36  }
  0x50   : > { %647 = vrot.lane.b32.xlu1 %v2170_v1, %s2008_s4  ;;  %s2025_s4 = smov 4  }
  0xae   : > { %v152_v2 = vpop.permute.xlu0 %151  ;;  %v242_v6 = vpop.permute.xlu1 %241 }
  0xaf   : > { %1680 = vmatpush3.xpose.msk.msra.mxu0 %vm153_vm1, %v152_v2  ;;  %1685 = vmatpush3.msra.mxu1 %v242_v6 }
  0xb0   : > { %1694 = vmatprep.subr.mxu0 %v2000_v0  ;;  %1689 = vmatprep.subr.mxu1 %v2000_v0 }
  0xb2   : > { %1682 = vmatmul.mubr.msk.f32.vlgmr.msra.gmra.mrb[0].mxu0 %vm153_vm1, %v2170_v1  ;;  %v320_v12 = vpop.permute.xlu1 %319 }
  0xb3   : > { %1696 = vmatprep.mubr.msk.f32.mxu0 %vm2001_vm0, %v2000_v0 }
  0xb6   : > { %v318_v13 = vpop.permute.xlu1 %317 }
  0xba   : > { %v485_v14 = vpop.permute.xlu1 %484 }
  0xbe   : > { %v483_v15 = vpop.permute.xlu1 %482 }
  0xc2   : > { %v648_v16 = vpop.permute.xlu1 %647 }
 0x185   : > { %v225_v3 = vpop.f32.mrb[0].mxu0 }
 0x186   : > { %v1683_v4 = vpop.f32.mrb[1].mxu0  ;;  %v230_v5 = vsel %vm229_vm2, %v225_v3, -inf }
 0x187   : > { %231 = vmax.xlane.f32.xlu0 %v230_v5 }
 0x19d   : > { %649 = vrot.lane.b32.xlu0 %v2170_v1, %s2009_s5  ;;  %s2026_s5 = smov 8  }
 0x1a1   : > { %1144 = vrot.lane.b32.xlu0 %v2170_v1, %s2010_s12  ;;  %s2027_s12 = smov 12  }
 0x1a5   : > { %1309 = vrot.lane.b32.xlu0 %v2170_v1, %s2011_s13  ;;  %s2028_s13 = smov 16  }
 0x214   : > { %v232_v7 = vpop.xlane.xlu0 %231 }
 0x215   : > { %v233_v8 = vsub.f32 %v225_v3, %v232_v7 }
 0x217   : > { %v234_v9 = vmul.f32 1.442695, %v233_v8 }
 0x218   : > { %v650_v22 = vpop.permute.xlu0 %649 }
 0x219   : > { %1853 = vpow2.f32 %v234_v9 }
 0x21c   : > { %v1145_v25 = vpop.permute.xlu0 %1144 }
 0x220   : > { %v1310_v27 = vpop.permute.xlu0 %1309 }
 0x223   : > { %v1854_v10 = vpop.eup %1853 }
 0x224   : > { %v236_v11 = vsel %vm229_vm2, %v1854_v10, 0.0 }
 0x225   : > { %237 = vadd.xlane.f32.xlu1 %v236_v11 }
 0x236   : > { %814 = vrot.lane.b32.xlu1 %v2170_v1, %s2012_s15  ;;  %s2029_s15 = smov 20  }
 0x23a   : > { %812 = vrot.lane.b32.xlu1 %v2170_v1, %s2013_s16  ;;  %s2030_s16 = smov 24  }
 0x23e   : > { %979 = vrot.lane.b32.xlu1 %v2170_v1, %s2014_s17  ;;  %s2031_s17 = smov 28  }
 0x242   : > { %977 = vrot.lane.b32.xlu1 %v2170_v1, %s2015_s22  ;;  %s1644_s22 = sshll.u32 %s1989_s9, 7  ;;  %s1515_s9 = scalar_lea.sflag [#allocation4], %s2154_s24 }
 0x246   : > { %1142 = vrot.lane.b32.xlu1 %v2170_v1, %s2016_s23  ;;  %s145_s23 = scalar_lea.vmem [#allocation5], %s1617_s25 }
 0x24a   : > { %1307 = vrot.lane.b32.xlu1 %v2170_v1, %s2017_s26  ;;  %s1529_s26 = sshll.u32 %s145_s23, 4  ;;  %s2299_s26 = int_to_ptr.vmem [resolvable:$true] %s1529_s26 }
 0x24b   : > { %s1915_s25 = scalar_lea.vmem %s2299_s26, 128 }
 0x24c   : > { %p1916_p8 = scmp.ne.s32.totalorder %s2299_s26, %s1915_s25 }
 0x24e   : > { %p1917_p11 = pnand %p1916_p8, %p2356_p9 }
 0x250   : > { %p1918_p0 = pneg %p1917_p11 }
 0x2b2   : > { %v238_v17 = vpop.xlane.xlu1 %237 }
 0x2b3   : > { %1855 = vrcp.f32 %v238_v17 }
 0x2b6   : > { %v815_v18 = vpop.permute.xlu1 %814 }
 0x2ba   : > { %v813_v21 = vpop.permute.xlu1 %812 }
 0x2bd   : > { %v1856_v19 = vpop.eup %1855 }
 0x2be   : > { %v240_v20 = vmul.f32 %v1856_v19, %v1854_v10  ;;  %v980_v23 = vpop.permute.xlu1 %979 }
 0x2c0   : > { %1687 = vmatmul.mubr.msk.f32.vlgmr.msra.gmra.mrb[0].mxu1 %vm229_vm2, %v240_v20 }
 0x2c1   : > { %1690 = vmatpush3.xpose.msk.msra.mxu1 %vm153_vm1, %v320_v12  ;;  %1691 = vmatprep.mubr.msk.f32.mxu1 %vm2001_vm0, %v2000_v0 }
 0x2c2   : > { %1699 = vmatprep.subr.mxu1 %v2000_v0  ;;  %v978_v24 = vpop.permute.xlu1 %977 }
 0x2c4   : > { %1692 = vmatmul.mubr.msk.f32.vlgmr.msra.gmra.mrb[2].mxu1 %vm153_vm1, %v318_v13 }
 0x2c5   : > { %1700 = vmatpush3.xpose.msk.msra.mxu1 %vm153_vm1, %v485_v14  ;;  %1701 = vmatprep.mubr.msk.f32.mxu1 %vm2001_vm0, %v2000_v0 }
 0x2c6   : > { %1709 = vmatprep.subr.mxu1 %v2000_v0  ;;  %v1143_v26 = vpop.permute.xlu1 %1142 }
 0x2c8   : > { %1702 = vmatmul.mubr.msk.f32.vlgmr.msra.gmra.mrb[4].mxu1 %vm153_vm1, %v483_v15 }
 0x2c9   : > { %1710 = vmatpush3.xpose.msk.msra.mxu1 %vm153_vm1, %v650_v22  ;;  %1711 = vmatprep.mubr.msk.f32.mxu1 %vm2001_vm0, %v2000_v0 }
 0x2ca   : > { %1719 = vmatprep.subr.mxu1 %v2000_v0  ;;  %v1308_v28 = vpop.permute.xlu1 %1307 }
 0x2cc   : > { %1712 = vmatmul.mubr.msk.f32.vlgmr.msra.gmra.mrb[6].mxu1 %vm153_vm1, %v648_v16 }
 0x2cd   : > { %1720 = vmatpush3.xpose.msk.msra.mxu1 %vm153_vm1, %v815_v18  ;;  %1721 = vmatprep.mubr.msk.f32.mxu1 %vm2001_vm0, %v2000_v0 }
 0x2ce   : > { %1729 = vmatprep.subr.mxu1 %v2000_v0 }
 0x2d0   : > { %1722 = vmatmul.mubr.msk.f32.vlgmr.msra.gmra.mrb[8].mxu1 %vm153_vm1, %v813_v21 }
 0x2d1   : > { %1730 = vmatpush3.xpose.msk.msra.mxu1 %vm153_vm1, %v980_v23  ;;  %1731 = vmatprep.mubr.msk.f32.mxu1 %vm2001_vm0, %v2000_v0 }
 0x2d2   : > { %1739 = vmatprep.subr.mxu1 %v2000_v0 }
 0x2d4   : > { %1732 = vmatmul.mubr.msk.f32.vlgmr.msra.gmra.mrb[10].mxu1 %vm153_vm1, %v978_v24 }
 0x2d5   : > { %1740 = vmatpush3.xpose.msk.msra.mxu1 %vm153_vm1, %v1145_v25  ;;  %1741 = vmatprep.mubr.msk.f32.mxu1 %vm2001_vm0, %v2000_v0 }
 0x2d6   : > { %1749 = vmatprep.subr.mxu1 %v2000_v0 }
 0x2d8   : > { %1742 = vmatmul.mubr.msk.f32.vlgmr.msra.gmra.mrb[12].mxu1 %vm153_vm1, %v1143_v26 }
 0x2d9   : > { %1750 = vmatpush3.xpose.msk.msra.mxu1 %vm153_vm1, %v1310_v27  ;;  %1751 = vmatprep.mubr.msk.f32.mxu1 %vm2001_vm0, %v2000_v0 }
 0x2dc   : > { %1752 = vmatmul.mubr.msk.f32.vlgmr.msra.gmra.mrb[14].mxu1 %vm153_vm1, %v1308_v28 }
 0x393   : > { %v2232_v29 = vpop.f32.mrb[0].mxu1 }
 0x394   : > { %v1688_v30 = vpop.f32.mrb[1].mxu1 }
 0x397   : > { %v391_v31 = vpop.f32.mrb[2].mxu1 }
 0x398   : > { %v1693_v32 = vpop.f32.mrb[3].mxu1  ;;  %v395_v33 = vsel %vm229_vm2, %v391_v31, -inf }
 0x399   : > { %396 = vmax.xlane.f32.xlu0 %v395_v33 }
 0x39b   : > { %v556_v34 = vpop.f32.mrb[4].mxu1 }
 0x39c   : > { %v1703_v35 = vpop.f32.mrb[5].mxu1  ;;  %v560_v36 = vsel %vm229_vm2, %v556_v34, -inf }
 0x39d   : > { %561 = vmax.xlane.f32.xlu1 %v560_v36 }
 0x39f   : > { %v721_v37 = vpop.f32.mrb[6].mxu1 }
 0x3a0   : > { %v1713_v38 = vpop.f32.mrb[7].mxu1  ;;  %v725_v39 = vsel %vm229_vm2, %v721_v37, -inf }
 0x3a1   : > { %726 = vmax.xlane.f32.xlu0 %v725_v39 }
 0x3a3   : > { %v886_v40 = vpop.f32.mrb[8].mxu1 }
 0x3a4   : > { %v890_v41 = vsel %vm229_vm2, %v886_v40, -inf  ;;  %v1723_v42 = vpop.f32.mrb[9].mxu1 }
 0x3a5   : > { %891 = vmax.xlane.f32.xlu0 %v890_v41 }
 0x3a7   : > { %v2238_v43 = vpop.f32.mrb[10].mxu1 }
 0x3a8   : > { %v1055_v44 = vsel %vm229_vm2, %v2238_v43, -inf  ;;  %v1733_v45 = vpop.f32.mrb[11].mxu1 }
 0x3a9   : > { %1056 = vmax.xlane.f32.xlu1 %v1055_v44 }
 0x3ab   : > { %v1216_v46 = vpop.f32.mrb[12].mxu1 }
 0x3ac   : > { %v1220_v47 = vsel %vm229_vm2, %v1216_v46, -inf  ;;  %v1743_v48 = vpop.f32.mrb[13].mxu1 }
 0x3ad   : > { %1221 = vmax.xlane.f32.xlu0 %v1220_v47 }
 0x3af   : > { %v1381_v49 = vpop.f32.mrb[14].mxu1 }
 0x3b0   : > { %v1385_v50 = vsel %vm229_vm2, %v1381_v49, -inf  ;;  %v1753_v51 = vpop.f32.mrb[15].mxu1 }
 0x3b1   : > { %1386 = vmax.xlane.f32.xlu1 %v1385_v50 }
 0x3c2   : > { %406 = vrot.lane.b32.xlu1 %v2170_v1, %s2018_s28 }
 0x3c3   : > { %571 = vrot.lane.b32.xlu0 %v2170_v1, %s2019_s27 }
 0x3c6   : > { %736 = vrot.lane.b32.xlu1 %v2170_v1, %s2020_s18  ;;  %s2297_s18 = scalar_lea.hbm %s2347_s1, %s1644_s22 }
 0x3ca   : > { %901 = vrot.lane.b32.xlu1 %v2170_v1, %s2021_s29  ;;  %s2032_s29 = smov [#allocation5]  }
 0x426   : > { %v397_v52 = vpop.xlane.xlu0 %396 }
 0x427   : > { %v398_v53 = vsub.f32 %v391_v31, %v397_v52 }
 0x429   : > { %v399_v54 = vmul.f32 1.442695, %v398_v53 }
 0x42a   : > { %v562_v55 = vpop.xlane.xlu1 %561 }
 0x42b   : > { %1857 = vpow2.f32 %v399_v54  ;;  %v563_v56 = vsub.f32 %v556_v34, %v562_v55 }
 0x42d   : > { %v564_v57 = vmul.f32 1.442695, %v563_v56 }
 0x42e   : > { %v727_v58 = vpop.xlane.xlu0 %726 }
 0x42f   : > { %1859 = vpow2.f32 %v564_v57  ;;  %v728_v59 = vsub.f32 %v721_v37, %v727_v58 }
 0x431   : > { %v729_v60 = vmul.f32 1.442695, %v728_v59 }
 0x432   : > { %v892_v61 = vpop.xlane.xlu0 %891 }
 0x433   : > { %1861 = vpow2.f32 %v729_v60  ;;  %v893_v62 = vsub.f32 %v886_v40, %v892_v61 }
 0x435   : > { %v1858_v63 = vpop.eup %1857  ;;  %v894_v2 = vmul.f32 1.442695, %v893_v62 }
 0x436   : > { %v401_v3 = vsel %vm229_vm2, %v1858_v63, 0.0  ;;  %v1057_v5 = vpop.xlane.xlu1 %1056 }
 0x437   : > { %1863 = vpow2.f32 %v894_v2  ;;  %402 = vadd.xlane.f32.xlu0 %v401_v3  ;;  %v1058_v18 = vsub.f32 %v2238_v43, %v1057_v5 }
 0x439   : > { %v1860_v4 = vpop.eup %1859  ;;  %v1059_v19 = vmul.f32 1.442695, %v1058_v18 }
 0x43a   : > { %v1222_v6 = vpop.xlane.xlu0 %1221  ;;  %v566_v7 = vsel %vm229_vm2, %v1860_v4, 0.0 }
 0x43b   : > { %v1223_v8 = vsub.f32 %v1216_v46, %v1222_v6  ;;  %567 = vadd.xlane.f32.xlu1 %v566_v7 }
 0x43d   : > { %v1862_v9 = vpop.eup %1861  ;;  %v1224_v10 = vmul.f32 1.442695, %v1223_v8 }
 0x43e   : > { %v1387_v11 = vpop.xlane.xlu1 %1386  ;;  %v731_v12 = vsel %vm229_vm2, %v1862_v9, 0.0  ;;  %v572_v27 = vpop.permute.xlu0 %571 }
 0x43f   : > { %1865 = vpow2.f32 %v1224_v10  ;;  %732 = vadd.xlane.f32.xlu0 %v731_v12  ;;  %v1388_v20 = vsub.f32 %v1381_v49, %v1387_v11 }
 0x440   : > { %1867 = vpow2.f32 %v1059_v19 }
 0x441   : > { %v1864_v13 = vpop.eup %1863  ;;  %v1389_v21 = vmul.f32 1.442695, %v1388_v20 }
 0x442   : > { %v896_v14 = vsel %vm229_vm2, %v1864_v13, 0.0  ;;  %v407_v15 = vpop.permute.xlu1 %406 }
 0x443   : > { %897 = vadd.xlane.f32.xlu1 %v896_v14  ;;  %1695 = vmatpush3.msra.mxu0 %v407_v15  ;;  %1869 = vpow2.f32 %v1389_v21 }
 0x444   : > { %1704 = vmatprep.subr.mxu0 %v2000_v0 }
 0x446   : > { %v737_v26 = vpop.permute.xlu1 %736 }
 0x449   : > { %v2253_v16 = vpop.eup %1865 }
 0x44a   : > { %v1226_v17 = vsel %vm229_vm2, %v2253_v16, 0.0  ;;  %v1868_v22 = vpop.eup %1867  ;;  %v902_v28 = vpop.permute.xlu1 %901 }
 0x44b   : > { %1227 = vadd.xlane.f32.xlu1 %v1226_v17  ;;  %v1061_v23 = vsel %vm229_vm2, %v1868_v22, 0.0 }
 0x44d   : > { %v1870_v24 = vpop.eup %1869 }
 0x44e   : > { %v1391_v25 = vsel %vm229_vm2, %v1870_v24, 0.0 }
 0x455   : > { %1066 = vrot.lane.b32.xlu0 %v2170_v1, %s2022_s30  ;;  %s1919_s30 = sshll.u32 %s2032_s29, 4  ;;  %s1920_s30 = int_to_ptr.vmem [resolvable:$false] %s1919_s30 }
 0x456   : > { %p1922_p7 = scmp.lt.s32.totalorder %s2299_s26, %s1920_s30 }
 0x45c   : > { %1231 = vrot.lane.b32.xlu1 %v2170_v1, %s2023_s2  ;;  %s1921_s2 = scalar_lea.vmem %s1920_s30, 256 }
 0x45d   : > { %p1923_p13 = scmp.lt.s32.totalorder %s1921_s2, %s1915_s25 }
 0x45f   : > { %p1924_p3 = por %p1923_p13, %p1922_p7 }
 0x461   : > { %p1925_p6 = pnand %p1924_p3, %p1918_p0 }
 0x474   : > { %1062 = vadd.xlane.f32.xlu0 %v1061_v23 }
 0x478   : > { %1392 = vadd.xlane.f32.xlu0 %v1391_v25 }
 0x48e   : > { %1396 = vrot.lane.b32.xlu0 %v2170_v1, %s2024_s3 }
 0x4c4   : > { %v403_v30 = vpop.xlane.xlu0 %402 }
 0x4c5   : > { %1871 = vrcp.f32 %v403_v30 }
 0x4c8   : > { %v568_v31 = vpop.xlane.xlu1 %567 }
 0x4c9   : > { %1873 = vrcp.f32 %v568_v31 }
 0x4cc   : > { %v733_v32 = vpop.xlane.xlu0 %732 }
 0x4cd   : > { %1875 = vrcp.f32 %v733_v32 }
 0x4cf   : > { %v1872_v33 = vpop.eup %1871 }
 0x4d0   : > { %v405_v34 = vmul.f32 %v1872_v33, %v1858_v63  ;;  %v898_v35 = vpop.xlane.xlu1 %897  ;;  %v1067_v41 = vpop.permute.xlu0 %1066 }
 0x4d1   : > { %1877 = vrcp.f32 %v898_v35 }
 0x4d2   : > { %1697 = vmatmul.mubr.msk.f32.vlgmr.msra.gmra.mrb[2].mxu0 %vm229_vm2, %v405_v34 }
 0x4d3   : > { %v1874_v36 = vpop.eup %1873  ;;  %1705 = vmatpush3.msra.mxu0 %v572_v27  ;;  %1706 = vmatprep.mubr.msk.f32.mxu0 %vm2001_vm0, %v2000_v0 }
 0x4d4   : > { %v570_v1 = vmul.f32 %v1874_v36, %v1860_v4  ;;  %1714 = vmatprep.subr.mxu0 %v2000_v0 }
 0x4d6   : > { %1707 = vmatmul.mubr.msk.f32.vlgmr.msra.gmra.mrb[4].mxu0 %vm229_vm2, %v570_v1 }
 0x4d7   : > { %v1876_v37 = vpop.eup %1875  ;;  %1715 = vmatpush3.msra.mxu0 %v737_v26  ;;  %1716 = vmatprep.mubr.msk.f32.mxu0 %vm2001_vm0, %v2000_v0 }
 0x4d8   : > { %v735_v38 = vmul.f32 %v1876_v37, %v1862_v9  ;;  %1724 = vmatprep.subr.mxu0 %v2000_v0  ;;  %v1228_v42 = vpop.xlane.xlu1 %1227 }
 0x4da   : > { %1717 = vmatmul.mubr.msk.f32.vlgmr.msra.gmra.mrb[6].mxu0 %vm229_vm2, %v735_v38 }
 0x4db   : > { %v1878_v39 = vpop.eup %1877  ;;  %1725 = vmatpush3.msra.mxu0 %v902_v28  ;;  %1726 = vmatprep.mubr.msk.f32.mxu0 %vm2001_vm0, %v2000_v0 }
 0x4dc   : > { %v900_v40 = vmul.f32 %v1878_v39, %v1864_v13  ;;  %1734 = vmatprep.subr.mxu0 %v2000_v0  ;;  %v1232_v47 = vpop.permute.xlu1 %1231 }
 0x4de   : > { %1727 = vmatmul.mubr.msk.f32.vlgmr.msra.gmra.mrb[8].mxu0 %vm229_vm2, %v900_v40 }
 0x4df   : > { %1735 = vmatpush3.msra.mxu0 %v1067_v41  ;;  %1736 = vmatprep.mubr.msk.f32.mxu0 %vm2001_vm0, %v2000_v0 }
 0x4e0   : > { %1744 = vmatprep.subr.mxu0 %v2000_v0 }
 0x501   : > { %v1063_v43 = vpop.xlane.xlu0 %1062 }
 0x502   : > { %1879 = vrcp.f32 %v1063_v43 }
 0x503   : > { %1881 = vrcp.f32 %v1228_v42 }
 0x505   : > { %v1393_v44 = vpop.xlane.xlu0 %1392 }
 0x506   : > { %1883 = vrcp.f32 %v1393_v44 }
 0x509   : > { %v1397_v50 = vpop.permute.xlu0 %1396 }
 0x50c   : > { %v1880_v45 = vpop.eup %1879 }
 0x50d   : > { %v1065_v46 = vmul.f32 %v1880_v45, %v1868_v22  ;;  %v1882_v48 = vpop.eup %1881 }
 0x50e   : > { %v1230_v49 = vmul.f32 %v1882_v48, %v2253_v16 }
 0x50f   : > { %1737 = vmatmul.mubr.msk.f32.vlgmr.msra.gmra.mrb[10].mxu0 %vm229_vm2, %v1065_v46 }
 0x510   : > { %1745 = vmatpush3.msra.mxu0 %v1232_v47  ;;  %1746 = vmatprep.mubr.msk.f32.mxu0 %vm2001_vm0, %v2000_v0  ;;  %v1884_v51 = vpop.eup %1883 }
 0x511   : > { %1754 = vmatprep.subr.mxu0 %v2000_v0  ;;  %v1395_v52 = vmul.f32 %v1884_v51, %v1870_v24 }
 0x513   : > { %1747 = vmatmul.mubr.msk.f32.vlgmr.msra.gmra.mrb[12].mxu0 %vm229_vm2, %v1230_v49 }
 0x514   : > { %1755 = vmatpush3.msra.mxu0 %v1397_v50  ;;  %1756 = vmatprep.mubr.msk.f32.mxu0 %vm2001_vm0, %v2000_v0 }
 0x517   : > { %1757 = vmatmul.mubr.msk.f32.vlgmr.msra.gmra.mrb[14].mxu0 %vm229_vm2, %v1395_v52 }
 0x5a5   : > { %v478_v53 = vpop.f32.mrb[2].mxu0 }
 0x5a6   : > { %1473 = vrot.lane.b32.xlu1 %v478_v53, %s2025_s4  ;;  %v1698_v54 = vpop.f32.mrb[3].mxu0 }
 0x5a9   : > { %v643_v55 = vpop.f32.mrb[4].mxu0 }
 0x5aa   : > { %1477 = vrot.lane.b32.xlu0 %v643_v55, %s2026_s5  ;;  %v1708_v56 = vpop.f32.mrb[5].mxu0 }
 0x5ad   : > { %v808_v57 = vpop.f32.mrb[6].mxu0 }
 0x5ae   : > { %1481 = vrot.lane.b32.xlu1 %v808_v57, %s2027_s12  ;;  %v1718_v58 = vpop.f32.mrb[7].mxu0 }
 0x5b1   : > { %v973_v59 = vpop.f32.mrb[8].mxu0 }
 0x5b2   : > { %1485 = vrot.lane.b32.xlu0 %v973_v59, %s2028_s13  ;;  %v1728_v60 = vpop.f32.mrb[9].mxu0 }
 0x5e2   : > { %v1138_v0 = vpop.f32.mrb[10].mxu0 }
 0x5e3   : > { %1489 = vrot.lane.b32.xlu1 %v1138_v0, %s2029_s15  ;;  %v1738_v61 = vpop.f32.mrb[11].mxu0 }
 0x5e6   : > { %v1303_v62 = vpop.f32.mrb[12].mxu0 }
 0x5e7   : > { %1493 = vrot.lane.b32.xlu0 %v1303_v62, %s2030_s16  ;;  %v1748_v63 = vpop.f32.mrb[13].mxu0 }
 0x5ea   : > { %v1468_v2 = vpop.f32.mrb[14].mxu0 }
 0x5eb   : > { %1497 = vrot.lane.b32.xlu1 %v1468_v2, %s2031_s17  ;;  %v1758_v3 = vpop.f32.mrb[15].mxu0 }
 0x618   : > { %v1474_v4 = vpop.permute.xlu1 %1473 }
 0x619   : > { %v1500_v8 = vsel %vm153_vm1, %v2232_v29, %v1474_v4 }
 0x61c   : > { %v1478_v5 = vpop.permute.xlu0 %1477 }
 0x61d   : > { %v1501_v9 = vsel %vm229_vm2, %v1500_v8, %v1478_v5 }
 0x620   : > { %v1482_v6 = vpop.permute.xlu1 %1481 }
 0x621   : > { %v1503_v11 = vsel %vm1502_vm3, %v1501_v9, %v1482_v6 }
 0x624   : > { %v1486_v7 = vpop.permute.xlu0 %1485 }
 0x625   : > { %v1505_v13 = vsel %vm1504_vm4, %v1503_v11, %v1486_v7 }
 0x655   : > { %v1490_v10 = vpop.permute.xlu1 %1489 }
 0x656   : > { %v1507_v14 = vsel %vm1506_vm5, %v1505_v13, %v1490_v10 }
 0x659   : > { %v1494_v12 = vpop.permute.xlu0 %1493 }
 0x65a   : > { %v1509_v15 = vsel %vm1508_vm6, %v1507_v14, %v1494_v12 }
 0x65d   : > { %v1498_v29 = vpop.permute.xlu1 %1497 }
 0x65e   : > { %v1511_v16 = vsel %vm1510_vm7, %v1509_v15, %v1498_v29 }
 0x65f   : > { %1513 = vst.msk [vmem:[%s145_s23] sm:$0xff] %vm1512_vm8, %v1511_v16 }
 0x660   : > { %1928 = shalt.err (!%p1925_p6)
}
 0x661   : > { %s1929_s24 = scalar_lea.hbm %s2297_s18, 128  ;;  %s1933_s5 = scalar_lea.hbm %s2347_s1, 256 }
 0x662   : > { %p1930_p4 = scmp.ne.s32.totalorder %s2297_s18, %s1929_s24  ;;  %p1934_p1 = scmp.lt.u32.totalorder %s2297_s18, %s2347_s1 }
 0x663   : > { %p1935_p2 = scmp.lt.u32.totalorder %s1933_s5, %s1929_s24  ;;  %p1937_p8 = scmp.lt.u32.totalorder %s1929_s24, %s2297_s18 }
 0x664   : > { %p1931_p10 = pnand %p1930_p4, %p2356_p9 }
 0x665   : > { %p1936_p5 = por %p1935_p2, %p1934_p1 }
 0x666   : > { %p1932_p12 = pneg %p1931_p10 }
 0x667   : > { %p1938_p11 = por %p1937_p8, %p1936_p5 }
 0x669   : > { %p1939_p0 = pnand %p1938_p11, %p1932_p12 }
 0x66b   : > { %1942 = shalt.err (!%p1939_p0)
}
 0x66c   : > { %1761 = dma.vmem_to_hbm [thread:$0]  (%p2356_p9), %s2299_s26, 128, %s2297_s18, %s1515_s9  }
 0x66d PF: > { %s1541_s15 = sand.u32 1, %s1977_s6   ;;  %p2357_p7 = scmp.ne.s32.totalorder %s2352_s21, 0 }
 0x66e   : > { %p2358_p13 = scmp.ge.s32.totalorder %s1997_s11, 2  ;;  %s1542_s16 = scalar_lea.sflag [#allocation4], %s1541_s15 }
 0x670   : > { %p1768_p3 = pnand %p2358_p13, %p2357_p7 }
 0x672   : > { %1972 = dma.done.wait (!%p1768_p3), %s1542_s16, 128  }
 0x673   : > { %1974 = vsyncadd (!%p1768_p3), %s1542_s16, 4294967168  ;;  %s17_s11 = sadd.s32 1, %s1997_s11   ;;  %s2359_s6 = smov %s1981_s7 }
 0x674   : > { %p14_p6 = scmp.ge.s32.totalorder %s17_s11, 4   ;;  %s2360_s7 = smov %s1985_s8 }
 0x675   : > { %s2361_s8 = smov %s2099_s20  ;;  %s2362_s9 = smov %s1993_s10 }
 0x676   : > { %s2363_s10 = smov %s2365_s14  ;;  %16 = sbr.rel (!%p14_p6) target bundleno = 6 (0x6), region = 70 }
 0x67d   :  { %1547 = vsyncpa [#allocation3], 1 }
 0x67e   :  { %1549 = vsyncpa [#allocation3 + $0x1], 1 }
 0x67f   :  { %1550 = vsyncpa [#allocation4], 1 }
 0x680   :  { %1552 = vsyncpa [#allocation4 + $0x1], 1 }

</bundles_post_ra>
